<compile_context>
chip_gen: v6e
topology: v6e:2x2x1
jax: 0.10.0
libtpu: 0.0.40
codegen_flags: <defaults>
</compile_context>

<pallas_src>
import jax
import jax.numpy as jnp
from jax.experimental import pallas as pl
from jax.experimental.pallas import tpu as pltpu


def neuro_translate_kernel(
    eeg_ref, audio_ref, video_ref,
    w_eeg_ref, b_eeg_ref, w_aud_ref, b_aud_ref, w_vid_ref, b_vid_ref,
    wq_ref, wkv_ref, wo_ref, bo_ref,
    out_ref, ctx_ref,
):
    f32 = jnp.float32
    cdt = wq_ref.dtype                      # MXU operand dtype (bf16 or f32)
    bblk, t_e, c_e = eeg_ref.shape
    _, t_a, c_a = audio_ref.shape
    _, t_v, c_v = video_ref.shape
    d = wq_ref.shape[1]                     # lane-padded feature dim (128)

    # ---- flatten batch into the sublane axis (reshape in f32, then cast) ----
    eeg = eeg_ref[...].reshape(bblk * t_e, c_e).astype(cdt)
    aud = audio_ref[...].reshape(bblk * t_a, c_a).astype(cdt)
    vid = video_ref[...].reshape(bblk * t_v, c_v).astype(cdt)

    # ---- modality encoders: Linear + ReLU (f32 accumulate / elementwise) ----
    eeg_feat = jnp.maximum(
        jnp.dot(eeg, w_eeg_ref[...], preferred_element_type=f32) + b_eeg_ref[...], 0.0)
    aud_feat = jnp.maximum(
        jnp.dot(aud, w_aud_ref[...], preferred_element_type=f32) + b_aud_ref[...], 0.0)
    vid_feat = jnp.maximum(
        jnp.dot(vid, w_vid_ref[...], preferred_element_type=f32) + b_vid_ref[...], 0.0)

    # ---- projections on flattened slabs; 1/sqrt(d) already folded into wq ---
    q = jnp.dot(eeg_feat.astype(cdt), wq_ref[...], preferred_element_type=f32)
    kv_a = jnp.dot(aud_feat.astype(cdt), wkv_ref[...], preferred_element_type=f32)
    kv_v = jnp.dot(vid_feat.astype(cdt), wkv_ref[...], preferred_element_type=f32)
    k_a, v_a = kv_a[:, :d], kv_a[:, d:]
    k_v, v_v = kv_v[:, :d], kv_v[:, d:]

    # ---- per-batch cross-attention: joint softmax over audio+video keys -----
    dn = (((1,), (1,)), ((), ()))           # contract feature dim: A @ B.T
    for i in range(bblk):                   # bblk is small & static (unrolled)
        q_i = q[i * t_e:(i + 1) * t_e].astype(cdt)
        s_a = jax.lax.dot_general(q_i, k_a[i * t_a:(i + 1) * t_a].astype(cdt),
                                  dn, preferred_element_type=f32)
        s_v = jax.lax.dot_general(q_i, k_v[i * t_v:(i + 1) * t_v].astype(cdt),
                                  dn, preferred_element_type=f32)
        m = jnp.maximum(jnp.max(s_a, axis=-1, keepdims=True),
                        jnp.max(s_v, axis=-1, keepdims=True))
        p_a = jnp.exp(s_a - m)
        p_v = jnp.exp(s_v - m)
        denom = (jnp.sum(p_a, axis=-1, keepdims=True)
                 + jnp.sum(p_v, axis=-1, keepdims=True))
        ctx_i = (jnp.dot(p_a.astype(cdt), v_a[i * t_a:(i + 1) * t_a].astype(cdt),
                         preferred_element_type=f32)
                 + jnp.dot(p_v.astype(cdt), v_v[i * t_v:(i + 1) * t_v].astype(cdt),
                           preferred_element_type=f32))
        ctx_ref[i * t_e:(i + 1) * t_e, :] = ctx_i * pl.reciprocal(denom, approx=True)

    # ---- output projection on the flattened slab (lane-dense store) ---------
    out = (jnp.dot(ctx_ref[...].astype(cdt), wo_ref[...], preferred_element_type=f32)
           + bo_ref[...])
    out_ref[...] = out.reshape(bblk, t_e, out_ref.shape[-1]).astype(out_ref.dtype)


def _round_up(x, m):
    return ((x + m - 1) // m) * m


WEIGHT_ORDER = ["w_eeg", "b_eeg", "w_aud", "b_aud", "w_vid", "b_vid",
                "wq", "wkv", "wo", "bo"]


def prepare_params(params, d_pad, d_out_pad, compute_dtype):
    """Pad feature dims to lane width (128), fold softmax scale into W_q,
    fuse the K/V projection weights into a single (D, 2D) matrix."""
    def pad2(x, rows, cols):
        return jnp.pad(x, ((0, rows - x.shape[0]), (0, cols - x.shape[1])))

    d = params["wq"].shape[0]
    scale = 1.0 / jnp.sqrt(jnp.float32(d))             # folded softmax scale
    wk_p = pad2(params["wk"], d_pad, d_pad)
    wv_p = pad2(params["wv"], d_pad, d_pad)
    weights = {
        "w_eeg": pad2(params["w_eeg"], params["w_eeg"].shape[0], d_pad),
        "w_aud": pad2(params["w_aud"], params["w_aud"].shape[0], d_pad),
        "w_vid": pad2(params["w_vid"], params["w_vid"].shape[0], d_pad),
        "wq":    pad2(params["wq"] * scale, d_pad, d_pad),
        "wkv":   jnp.concatenate([wk_p, wv_p], axis=1),  # fused K/V projection
        "wo":    pad2(params["wo"], d_pad, d_out_pad),
    }
    biases = {
        "b_eeg": pad2(params["b_eeg"], 1, d_pad),
        "b_aud": pad2(params["b_aud"], 1, d_pad),
        "b_vid": pad2(params["b_vid"], 1, d_pad),
        "bo":    pad2(params["bo"], 1, d_out_pad),
    }
    prepped = {k: v.astype(compute_dtype) for k, v in weights.items()}
    prepped.update({k: v.astype(jnp.float32) for k, v in biases.items()})
    return prepped


def neuro_translate(eeg, audio, video, params, *, batch_block=None,
                    compute_dtype=jnp.bfloat16):
    B, T_e, C_e = eeg.shape
    _, T_a, C_a = audio.shape
    _, T_v, C_v = video.shape
    D = params["wq"].shape[0]
    D_out = params["wo"].shape[1]
    d_pad = _round_up(D, 128)        # lane-dense feature dim
    d_out_pad = _round_up(D_out, 128)

    if batch_block is None:
        # Pack batches onto the sublane axis, but keep >= 2 grid steps where
        # possible so both v7x TensorCores get work (neutral on v5e/v6e).
        batch_block = B // 2 if (B >= 2 and B % 2 == 0) else 1
    assert B % batch_block == 0, (B, batch_block)

    p = prepare_params(params, d_pad, d_out_pad, compute_dtype)

    def batch_spec(t, c):
        return pl.BlockSpec((batch_block, t, c), lambda b: (b, 0, 0))

    def full_spec(shape):
        nd = len(shape)
        return pl.BlockSpec(shape, lambda b, nd=nd: (0,) * nd)

    # Advisory cost estimate so XLA schedules the custom call sensibly.
    T_kv = T_a + T_v
    flops = 2 * B * (
        T_e * C_e * d_pad + T_a * C_a * d_pad + T_v * C_v * d_pad   # encoders
        + T_e * d_pad * d_pad                                       # Q proj
        + T_kv * d_pad * (2 * d_pad)                                # fused K/V
        + 2 * T_e * T_kv * d_pad                                    # scores+ctx
        + T_e * d_pad * d_out_pad)                                  # out proj
    in_bytes = sum(int(a.size) * a.dtype.itemsize for a in (eeg, audio, video))
    w_bytes = sum(int(p[n].size) * p[n].dtype.itemsize for n in WEIGHT_ORDER)
    out_bytes = B * T_e * d_out_pad * 4
    cost = pl.CostEstimate(flops=flops,
                           transcendentals=B * T_e * T_kv,
                           bytes_accessed=in_bytes + w_bytes + out_bytes)

    grid_spec = pltpu.PrefetchScalarGridSpec(
        num_scalar_prefetch=0,
        grid=(B // batch_block,),
        in_specs=[batch_spec(T_e, C_e),
                  batch_spec(T_a, C_a),
                  batch_spec(T_v, C_v)]
                 + [full_spec(p[n].shape) for n in WEIGHT_ORDER],
        out_specs=pl.BlockSpec((batch_block, T_e, d_out_pad),
                               lambda b: (b, 0, 0)),
        scratch_shapes=[pltpu.VMEM((batch_block * T_e, d_pad), jnp.float32)],
    )

    out_padded = pl.pallas_call(
        neuro_translate_kernel,
        out_shape=jax.ShapeDtypeStruct((B, T_e, d_out_pad), jnp.float32),
        grid_spec=grid_spec,
        compiler_params=pltpu.CompilerParams(dimension_semantics=("parallel",)),
        cost_estimate=cost,
    )(eeg, audio, video, *[p[n] for n in WEIGHT_ORDER])

    return out_padded[..., :D_out]   # strip lane padding (cheap XLA slice)


def neuro_translate_ref(eeg, audio, video, p):
    """Pure-JAX f32 reference for correctness checking."""
    eeg_f = jax.nn.relu(eeg @ p["w_eeg"] + p["b_eeg"])
    aud_f = jax.nn.relu(audio @ p["w_aud"] + p["b_aud"])
    vid_f = jax.nn.relu(video @ p["w_vid"] + p["b_vid"])
    kv = jnp.concatenate([aud_f, vid_f], axis=1)
    q = eeg_f @ p["wq"]
    k = kv @ p["wk"]
    v = kv @ p["wv"]
    scores = jnp.einsum("bqd,bkd->bqk", q, k) / jnp.sqrt(jnp.float32(q.shape[-1]))
    attn = jax.nn.softmax(scores, axis=-1)
    ctx = jnp.einsum("bqk,bkd->bqd", attn, v)
    return ctx @ p["wo"] + p["bo"]


def make_params(key, c_eeg, c_aud, c_vid, d, d_out):
    ks = jax.random.split(key, 11)
    scale = 0.1

    def w(k, shape):
        return (scale * jax.random.normal(k, shape)).astype(jnp.float32)

    return {
        "w_eeg": w(ks[0], (c_eeg, d)), "b_eeg": w(ks[1], (1, d)),
        "w_aud": w(ks[2], (c_aud, d)), "b_aud": w(ks[3], (1, d)),
        "w_vid": w(ks[4], (c_vid, d)), "b_vid": w(ks[5], (1, d)),
        "wq": w(ks[6], (d, d)), "wk": w(ks[7], (d, d)), "wv": w(ks[8], (d, d)),
        "wo": w(ks[9], (d, d_out)), "bo": w(ks[10], (1, d_out)),
    }


if __name__ == "__main__":
    B = 4
    T_EEG, C_EEG = 8, 16
    T_AUD, C_AUD = 8, 12
    T_VID, C_VID = 8, 24
    D, D_OUT = 32, 32

    key = jax.random.PRNGKey(0)
    k_eeg, k_aud, k_vid, k_p = jax.random.split(key, 4)

    eeg = jax.random.normal(k_eeg, (B, T_EEG, C_EEG), dtype=jnp.float32)
    audio = jax.random.normal(k_aud, (B, T_AUD, C_AUD), dtype=jnp.float32)
    video = jax.random.normal(k_vid, (B, T_VID, C_VID), dtype=jnp.float32)
    params = make_params(k_p, C_EEG, C_AUD, C_VID, D, D_OUT)

    # bf16 MXU-operand path (v6e/v7x fast path) and f32 path (tight check).
    out_bf16 = jax.block_until_ready(
        neuro_translate(eeg, audio, video, params, compute_dtype=jnp.bfloat16))
    out_f32 = jax.block_until_ready(
        neuro_translate(eeg, audio, video, params, compute_dtype=jnp.float32))

    ref = neuro_translate_ref(eeg, audio, video, params)
    assert out_bf16.shape == (B, T_EEG, D_OUT), out_bf16.shape
    assert out_f32.shape == (B, T_EEG, D_OUT), out_f32.shape
    assert jnp.allclose(out_f32, ref, atol=1e-3, rtol=1e-3), "f32 mismatch vs reference"
    assert jnp.allclose(out_bf16, ref, atol=3e-2, rtol=3e-2), "bf16 mismatch vs reference"

    print("KERNEL_OK")
</pallas_src>

<mosaic_0001>
module attributes {stable_mosaic.version = 11 : i64} {
  func.func @neuro_translate_kernel(%arg0: i32, %arg1: memref<2x8x16xf32, #tpu.memory_space<vmem>>, %arg2: memref<2x8x12xf32, #tpu.memory_space<vmem>>, %arg3: memref<2x8x24xf32, #tpu.memory_space<vmem>>, %arg4: memref<16x128xbf16, #tpu.memory_space<vmem>>, %arg5: memref<1x128xf32, #tpu.memory_space<vmem>>, %arg6: memref<12x128xbf16, #tpu.memory_space<vmem>>, %arg7: memref<1x128xf32, #tpu.memory_space<vmem>>, %arg8: memref<24x128xbf16, #tpu.memory_space<vmem>>, %arg9: memref<1x128xf32, #tpu.memory_space<vmem>>, %arg10: memref<128x128xbf16, #tpu.memory_space<vmem>>, %arg11: memref<128x256xbf16, #tpu.memory_space<vmem>>, %arg12: memref<128x128xbf16, #tpu.memory_space<vmem>>, %arg13: memref<1x128xf32, #tpu.memory_space<vmem>>, %arg14: memref<2x8x128xf32, #tpu.memory_space<vmem>>, %arg15: memref<16x128xf32, #tpu.memory_space<vmem>>) attributes {dimension_semantics = [#tpu.dimension_semantics<parallel>], iteration_bounds = array<i64: 2>, scalar_prefetch = 0 : i64, scratch_operands = 1 : i64, tpu.core_type = #tpu.core_type<tc>, window_params = [{transform_indices = @transform_0, window_bounds = array<i64: 2, 8, 16>}, {transform_indices = @transform_1, window_bounds = array<i64: 2, 8, 12>}, {transform_indices = @transform_2, window_bounds = array<i64: 2, 8, 24>}, {pipeline_mode = #tpu.pipeline_mode<synchronous>, transform_indices = @transform_3, window_bounds = array<i64: 16, 128>}, {pipeline_mode = #tpu.pipeline_mode<synchronous>, transform_indices = @transform_4, window_bounds = array<i64: 1, 128>}, {pipeline_mode = #tpu.pipeline_mode<synchronous>, transform_indices = @transform_5, window_bounds = array<i64: 12, 128>}, {pipeline_mode = #tpu.pipeline_mode<synchronous>, transform_indices = @transform_6, window_bounds = array<i64: 1, 128>}, {pipeline_mode = #tpu.pipeline_mode<synchronous>, transform_indices = @transform_7, window_bounds = array<i64: 24, 128>}, {pipeline_mode = #tpu.pipeline_mode<synchronous>, transform_indices = @transform_8, window_bounds = array<i64: 1, 128>}, {pipeline_mode = #tpu.pipeline_mode<synchronous>, transform_indices = @transform_9, window_bounds = array<i64: 128, 128>}, {pipeline_mode = #tpu.pipeline_mode<synchronous>, transform_indices = @transform_10, window_bounds = array<i64: 128, 256>}, {pipeline_mode = #tpu.pipeline_mode<synchronous>, transform_indices = @transform_11, window_bounds = array<i64: 128, 128>}, {pipeline_mode = #tpu.pipeline_mode<synchronous>, transform_indices = @transform_12, window_bounds = array<i64: 1, 128>}, {transform_indices = @transform_13, window_bounds = array<i64: 2, 8, 128>}]} {
    %c0 = arith.constant 0 : index
    %c0_0 = arith.constant 0 : index
    %c0_1 = arith.constant 0 : index
    %0 = vector.load %arg1[%c0, %c0_0, %c0_1] : memref<2x8x16xf32, #tpu.memory_space<vmem>>, vector<2x8x16xf32>
    %1 = vector.shape_cast %0 : vector<2x8x16xf32> to vector<16x16xf32>
    %2 = arith.truncf %1 : vector<16x16xf32> to vector<16x16xbf16>
    %c0_2 = arith.constant 0 : index
    %c0_3 = arith.constant 0 : index
    %c0_4 = arith.constant 0 : index
    %3 = vector.load %arg2[%c0_2, %c0_3, %c0_4] : memref<2x8x12xf32, #tpu.memory_space<vmem>>, vector<2x8x12xf32>
    %4 = vector.shape_cast %3 : vector<2x8x12xf32> to vector<16x12xf32>
    %5 = arith.truncf %4 : vector<16x12xf32> to vector<16x12xbf16>
    %c0_5 = arith.constant 0 : index
    %c0_6 = arith.constant 0 : index
    %c0_7 = arith.constant 0 : index
    %6 = vector.load %arg3[%c0_5, %c0_6, %c0_7] : memref<2x8x24xf32, #tpu.memory_space<vmem>>, vector<2x8x24xf32>
    %7 = vector.shape_cast %6 : vector<2x8x24xf32> to vector<16x24xf32>
    %8 = arith.truncf %7 : vector<16x24xf32> to vector<16x24xbf16>
    %c0_8 = arith.constant 0 : index
    %c0_9 = arith.constant 0 : index
    %9 = vector.load %arg4[%c0_8, %c0_9] : memref<16x128xbf16, #tpu.memory_space<vmem>>, vector<16x128xbf16>
    %cst = arith.constant dense<0.000000e+00> : vector<16x128xf32>
    %10 = tpu.matmul %2, %9, %cst {dimension_numbers = #tpu.dot_dimension_numbers<[1], [0], [0], [1], [0, 0, 1, 1], [], []>} : vector<16x16xbf16>, vector<16x128xbf16>, vector<16x128xf32> -> vector<16x128xf32>
    %c0_10 = arith.constant 0 : index
    %c0_11 = arith.constant 0 : index
    %11 = vector.load %arg5[%c0_10, %c0_11] : memref<1x128xf32, #tpu.memory_space<vmem>>, vector<1x128xf32>
    %12 = vector.broadcast %11 : vector<1x128xf32> to vector<16x128xf32>
    %13 = arith.addf %10, %12 : vector<16x128xf32>
    %cst_12 = arith.constant 0.000000e+00 : f32
    %14 = vector.broadcast %cst_12 : f32 to vector<16x128xf32>
    %15 = arith.maximumf %13, %14 : vector<16x128xf32>
    %c0_13 = arith.constant 0 : index
    %c0_14 = arith.constant 0 : index
    %16 = vector.load %arg6[%c0_13, %c0_14] : memref<12x128xbf16, #tpu.memory_space<vmem>>, vector<12x128xbf16>
    %cst_15 = arith.constant dense<0.000000e+00> : vector<16x128xf32>
    %17 = tpu.matmul %5, %16, %cst_15 {dimension_numbers = #tpu.dot_dimension_numbers<[1], [0], [0], [1], [0, 0, 1, 1], [], []>} : vector<16x12xbf16>, vector<12x128xbf16>, vector<16x128xf32> -> vector<16x128xf32>
    %c0_16 = arith.constant 0 : index
    %c0_17 = arith.constant 0 : index
    %18 = vector.load %arg7[%c0_16, %c0_17] : memref<1x128xf32, #tpu.memory_space<vmem>>, vector<1x128xf32>
    %19 = vector.broadcast %18 : vector<1x128xf32> to vector<16x128xf32>
    %20 = arith.addf %17, %19 : vector<16x128xf32>
    %cst_18 = arith.constant 0.000000e+00 : f32
    %21 = vector.broadcast %cst_18 : f32 to vector<16x128xf32>
    %22 = arith.maximumf %20, %21 : vector<16x128xf32>
    %c0_19 = arith.constant 0 : index
    %c0_20 = arith.constant 0 : index
    %23 = vector.load %arg8[%c0_19, %c0_20] : memref<24x128xbf16, #tpu.memory_space<vmem>>, vector<24x128xbf16>
    %cst_21 = arith.constant dense<0.000000e+00> : vector<16x128xf32>
    %24 = tpu.matmul %8, %23, %cst_21 {dimension_numbers = #tpu.dot_dimension_numbers<[1], [0], [0], [1], [0, 0, 1, 1], [], []>} : vector<16x24xbf16>, vector<24x128xbf16>, vector<16x128xf32> -> vector<16x128xf32>
    %c0_22 = arith.constant 0 : index
    %c0_23 = arith.constant 0 : index
    %25 = vector.load %arg9[%c0_22, %c0_23] : memref<1x128xf32, #tpu.memory_space<vmem>>, vector<1x128xf32>
    %26 = vector.broadcast %25 : vector<1x128xf32> to vector<16x128xf32>
    %27 = arith.addf %24, %26 : vector<16x128xf32>
    %cst_24 = arith.constant 0.000000e+00 : f32
    %28 = vector.broadcast %cst_24 : f32 to vector<16x128xf32>
    %29 = arith.maximumf %27, %28 : vector<16x128xf32>
    %30 = arith.truncf %15 : vector<16x128xf32> to vector<16x128xbf16>
    %c0_25 = arith.constant 0 : index
    %c0_26 = arith.constant 0 : index
    %31 = vector.load %arg10[%c0_25, %c0_26] : memref<128x128xbf16, #tpu.memory_space<vmem>>, vector<128x128xbf16>
    %cst_27 = arith.constant dense<0.000000e+00> : vector<16x128xf32>
    %32 = tpu.matmul %30, %31, %cst_27 {dimension_numbers = #tpu.dot_dimension_numbers<[1], [0], [0], [1], [0, 0, 1, 1], [], []>} : vector<16x128xbf16>, vector<128x128xbf16>, vector<16x128xf32> -> vector<16x128xf32>
    %33 = arith.truncf %22 : vector<16x128xf32> to vector<16x128xbf16>
    %c0_28 = arith.constant 0 : index
    %c0_29 = arith.constant 0 : index
    %34 = vector.load %arg11[%c0_28, %c0_29] : memref<128x256xbf16, #tpu.memory_space<vmem>>, vector<128x256xbf16>
    %cst_30 = arith.constant dense<0.000000e+00> : vector<16x256xf32>
    %35 = tpu.matmul %33, %34, %cst_30 {dimension_numbers = #tpu.dot_dimension_numbers<[1], [0], [0], [1], [0, 0, 1, 1], [], []>} : vector<16x128xbf16>, vector<128x256xbf16>, vector<16x256xf32> -> vector<16x256xf32>
    %36 = arith.truncf %29 : vector<16x128xf32> to vector<16x128xbf16>
    %c0_31 = arith.constant 0 : index
    %c0_32 = arith.constant 0 : index
    %37 = vector.load %arg11[%c0_31, %c0_32] : memref<128x256xbf16, #tpu.memory_space<vmem>>, vector<128x256xbf16>
    %cst_33 = arith.constant dense<0.000000e+00> : vector<16x256xf32>
    %38 = tpu.matmul %36, %37, %cst_33 {dimension_numbers = #tpu.dot_dimension_numbers<[1], [0], [0], [1], [0, 0, 1, 1], [], []>} : vector<16x128xbf16>, vector<128x256xbf16>, vector<16x256xf32> -> vector<16x256xf32>
    %39 = vector.extract_strided_slice %35 {offsets = [0, 0], sizes = [16, 128], strides = [1, 1]} : vector<16x256xf32> to vector<16x128xf32>
    %40 = vector.extract_strided_slice %35 {offsets = [0, 128], sizes = [16, 128], strides = [1, 1]} : vector<16x256xf32> to vector<16x128xf32>
    %41 = vector.extract_strided_slice %38 {offsets = [0, 0], sizes = [16, 128], strides = [1, 1]} : vector<16x256xf32> to vector<16x128xf32>
    %42 = vector.extract_strided_slice %38 {offsets = [0, 128], sizes = [16, 128], strides = [1, 1]} : vector<16x256xf32> to vector<16x128xf32>
    %43 = vector.extract_strided_slice %32 {offsets = [0, 0], sizes = [8, 128], strides = [1, 1]} : vector<16x128xf32> to vector<8x128xf32>
    %44 = arith.truncf %43 : vector<8x128xf32> to vector<8x128xbf16>
    %45 = vector.extract_strided_slice %39 {offsets = [0, 0], sizes = [8, 128], strides = [1, 1]} : vector<16x128xf32> to vector<8x128xf32>
    %46 = arith.truncf %45 : vector<8x128xf32> to vector<8x128xbf16>
    %cst_34 = arith.constant dense<0.000000e+00> : vector<8x8xf32>
    %47 = tpu.matmul %44, %46, %cst_34 {dimension_numbers = #tpu.dot_dimension_numbers<[1], [1], [0], [0], [0, 0, 1, 0], [], []>} : vector<8x128xbf16>, vector<8x128xbf16>, vector<8x8xf32> -> vector<8x8xf32>
    %48 = vector.extract_strided_slice %41 {offsets = [0, 0], sizes = [8, 128], strides = [1, 1]} : vector<16x128xf32> to vector<8x128xf32>
    %49 = arith.truncf %48 : vector<8x128xf32> to vector<8x128xbf16>
    %cst_35 = arith.constant dense<0.000000e+00> : vector<8x8xf32>
    %50 = tpu.matmul %44, %49, %cst_35 {dimension_numbers = #tpu.dot_dimension_numbers<[1], [1], [0], [0], [0, 0, 1, 0], [], []>} : vector<8x128xbf16>, vector<8x128xbf16>, vector<8x8xf32> -> vector<8x8xf32>
    %cst_36 = arith.constant dense<0xFF800000> : vector<8xf32>
    %51 = vector.multi_reduction <maximumf>, %47, %cst_36 [1] : vector<8x8xf32> to vector<8xf32>
    %52 = vector.shape_cast %51 : vector<8xf32> to vector<8x1xf32>
    %cst_37 = arith.constant dense<0xFF800000> : vector<8xf32>
    %53 = vector.multi_reduction <maximumf>, %50, %cst_37 [1] : vector<8x8xf32> to vector<8xf32>
    %54 = vector.shape_cast %53 : vector<8xf32> to vector<8x1xf32>
    %55 = arith.maximumf %52, %54 : vector<8x1xf32>
    %56 = vector.broadcast %55 : vector<8x1xf32> to vector<8x8xf32>
    %57 = arith.subf %47, %56 : vector<8x8xf32>
    %58 = math.exp %57 : vector<8x8xf32>
    %59 = vector.broadcast %55 : vector<8x1xf32> to vector<8x8xf32>
    %60 = arith.subf %50, %59 : vector<8x8xf32>
    %61 = math.exp %60 : vector<8x8xf32>
    %cst_38 = arith.constant dense<0.000000e+00> : vector<8xf32>
    %62 = vector.multi_reduction <add>, %58, %cst_38 [1] : vector<8x8xf32> to vector<8xf32>
    %63 = vector.shape_cast %62 : vector<8xf32> to vector<8x1xf32>
    %cst_39 = arith.constant dense<0.000000e+00> : vector<8xf32>
    %64 = vector.multi_reduction <add>, %61, %cst_39 [1] : vector<8x8xf32> to vector<8xf32>
    %65 = vector.shape_cast %64 : vector<8xf32> to vector<8x1xf32>
    %66 = arith.addf %63, %65 : vector<8x1xf32>
    %67 = arith.truncf %58 : vector<8x8xf32> to vector<8x8xbf16>
    %68 = vector.extract_strided_slice %40 {offsets = [0, 0], sizes = [8, 128], strides = [1, 1]} : vector<16x128xf32> to vector<8x128xf32>
    %69 = arith.truncf %68 : vector<8x128xf32> to vector<8x128xbf16>
    %cst_40 = arith.constant dense<0.000000e+00> : vector<8x128xf32>
    %70 = tpu.matmul %67, %69, %cst_40 {dimension_numbers = #tpu.dot_dimension_numbers<[1], [0], [0], [1], [0, 0, 1, 1], [], []>} : vector<8x8xbf16>, vector<8x128xbf16>, vector<8x128xf32> -> vector<8x128xf32>
    %71 = arith.truncf %61 : vector<8x8xf32> to vector<8x8xbf16>
    %72 = vector.extract_strided_slice %42 {offsets = [0, 0], sizes = [8, 128], strides = [1, 1]} : vector<16x128xf32> to vector<8x128xf32>
    %73 = arith.truncf %72 : vector<8x128xf32> to vector<8x128xbf16>
    %cst_41 = arith.constant dense<0.000000e+00> : vector<8x128xf32>
    %74 = tpu.matmul %71, %73, %cst_41 {dimension_numbers = #tpu.dot_dimension_numbers<[1], [0], [0], [1], [0, 0, 1, 1], [], []>} : vector<8x8xbf16>, vector<8x128xbf16>, vector<8x128xf32> -> vector<8x128xf32>
    %75 = arith.addf %70, %74 : vector<8x128xf32>
    %76 = tpu.reciprocal %66 {approx = true} : vector<8x1xf32> -> vector<8x1xf32>
    %77 = vector.broadcast %76 : vector<8x1xf32> to vector<8x128xf32>
    %78 = arith.mulf %75, %77 : vector<8x128xf32>
    %c0_42 = arith.constant 0 : index
    %c0_43 = arith.constant 0 : index
    %79 = vector.load %arg15[%c0_42, %c0_43] : memref<16x128xf32, #tpu.memory_space<vmem>>, vector<8x128xf32>
    tpu.vector_store %arg15[%c0_42, %c0_43], %78 {strides = array<i32>} : memref<16x128xf32, #tpu.memory_space<vmem>>, vector<8x128xf32>,
    %80 = vector.extract_strided_slice %32 {offsets = [8, 0], sizes = [8, 128], strides = [1, 1]} : vector<16x128xf32> to vector<8x128xf32>
    %81 = arith.truncf %80 : vector<8x128xf32> to vector<8x128xbf16>
    %82 = vector.extract_strided_slice %39 {offsets = [8, 0], sizes = [8, 128], strides = [1, 1]} : vector<16x128xf32> to vector<8x128xf32>
    %83 = arith.truncf %82 : vector<8x128xf32> to vector<8x128xbf16>
    %cst_44 = arith.constant dense<0.000000e+00> : vector<8x8xf32>
    %84 = tpu.matmul %81, %83, %cst_44 {dimension_numbers = #tpu.dot_dimension_numbers<[1], [1], [0], [0], [0, 0, 1, 0], [], []>} : vector<8x128xbf16>, vector<8x128xbf16>, vector<8x8xf32> -> vector<8x8xf32>
    %85 = vector.extract_strided_slice %41 {offsets = [8, 0], sizes = [8, 128], strides = [1, 1]} : vector<16x128xf32> to vector<8x128xf32>
    %86 = arith.truncf %85 : vector<8x128xf32> to vector<8x128xbf16>
    %cst_45 = arith.constant dense<0.000000e+00> : vector<8x8xf32>
    %87 = tpu.matmul %81, %86, %cst_45 {dimension_numbers = #tpu.dot_dimension_numbers<[1], [1], [0], [0], [0, 0, 1, 0], [], []>} : vector<8x128xbf16>, vector<8x128xbf16>, vector<8x8xf32> -> vector<8x8xf32>
    %cst_46 = arith.constant dense<0xFF800000> : vector<8xf32>
    %88 = vector.multi_reduction <maximumf>, %84, %cst_46 [1] : vector<8x8xf32> to vector<8xf32>
    %89 = vector.shape_cast %88 : vector<8xf32> to vector<8x1xf32>
    %cst_47 = arith.constant dense<0xFF800000> : vector<8xf32>
    %90 = vector.multi_reduction <maximumf>, %87, %cst_47 [1] : vector<8x8xf32> to vector<8xf32>
    %91 = vector.shape_cast %90 : vector<8xf32> to vector<8x1xf32>
    %92 = arith.maximumf %89, %91 : vector<8x1xf32>
    %93 = vector.broadcast %92 : vector<8x1xf32> to vector<8x8xf32>
    %94 = arith.subf %84, %93 : vector<8x8xf32>
    %95 = math.exp %94 : vector<8x8xf32>
    %96 = vector.broadcast %92 : vector<8x1xf32> to vector<8x8xf32>
    %97 = arith.subf %87, %96 : vector<8x8xf32>
    %98 = math.exp %97 : vector<8x8xf32>
    %cst_48 = arith.constant dense<0.000000e+00> : vector<8xf32>
    %99 = vector.multi_reduction <add>, %95, %cst_48 [1] : vector<8x8xf32> to vector<8xf32>
    %100 = vector.shape_cast %99 : vector<8xf32> to vector<8x1xf32>
    %cst_49 = arith.constant dense<0.000000e+00> : vector<8xf32>
    %101 = vector.multi_reduction <add>, %98, %cst_49 [1] : vector<8x8xf32> to vector<8xf32>
    %102 = vector.shape_cast %101 : vector<8xf32> to vector<8x1xf32>
    %103 = arith.addf %100, %102 : vector<8x1xf32>
    %104 = arith.truncf %95 : vector<8x8xf32> to vector<8x8xbf16>
    %105 = vector.extract_strided_slice %40 {offsets = [8, 0], sizes = [8, 128], strides = [1, 1]} : vector<16x128xf32> to vector<8x128xf32>
    %106 = arith.truncf %105 : vector<8x128xf32> to vector<8x128xbf16>
    %cst_50 = arith.constant dense<0.000000e+00> : vector<8x128xf32>
    %107 = tpu.matmul %104, %106, %cst_50 {dimension_numbers = #tpu.dot_dimension_numbers<[1], [0], [0], [1], [0, 0, 1, 1], [], []>} : vector<8x8xbf16>, vector<8x128xbf16>, vector<8x128xf32> -> vector<8x128xf32>
    %108 = arith.truncf %98 : vector<8x8xf32> to vector<8x8xbf16>
    %109 = vector.extract_strided_slice %42 {offsets = [8, 0], sizes = [8, 128], strides = [1, 1]} : vector<16x128xf32> to vector<8x128xf32>
    %110 = arith.truncf %109 : vector<8x128xf32> to vector<8x128xbf16>
    %cst_51 = arith.constant dense<0.000000e+00> : vector<8x128xf32>
    %111 = tpu.matmul %108, %110, %cst_51 {dimension_numbers = #tpu.dot_dimension_numbers<[1], [0], [0], [1], [0, 0, 1, 1], [], []>} : vector<8x8xbf16>, vector<8x128xbf16>, vector<8x128xf32> -> vector<8x128xf32>
    %112 = arith.addf %107, %111 : vector<8x128xf32>
    %113 = tpu.reciprocal %103 {approx = true} : vector<8x1xf32> -> vector<8x1xf32>
    %114 = vector.broadcast %113 : vector<8x1xf32> to vector<8x128xf32>
    %115 = arith.mulf %112, %114 : vector<8x128xf32>
    %c8 = arith.constant 8 : index
    %c0_52 = arith.constant 0 : index
    %116 = vector.load %arg15[%c8, %c0_52] : memref<16x128xf32, #tpu.memory_space<vmem>>, vector<8x128xf32>
    tpu.vector_store %arg15[%c8, %c0_52], %115 {strides = array<i32>} : memref<16x128xf32, #tpu.memory_space<vmem>>, vector<8x128xf32>,
    %c0_53 = arith.constant 0 : index
    %c0_54 = arith.constant 0 : index
    %117 = vector.load %arg15[%c0_53, %c0_54] : memref<16x128xf32, #tpu.memory_space<vmem>>, vector<16x128xf32>
    %118 = arith.truncf %117 : vector<16x128xf32> to vector<16x128xbf16>
    %c0_55 = arith.constant 0 : index
    %c0_56 = arith.constant 0 : index
    %119 = vector.load %arg12[%c0_55, %c0_56] : memref<128x128xbf16, #tpu.memory_space<vmem>>, vector<128x128xbf16>
    %cst_57 = arith.constant dense<0.000000e+00> : vector<16x128xf32>
    %120 = tpu.matmul %118, %119, %cst_57 {dimension_numbers = #tpu.dot_dimension_numbers<[1], [0], [0], [1], [0, 0, 1, 1], [], []>} : vector<16x128xbf16>, vector<128x128xbf16>, vector<16x128xf32> -> vector<16x128xf32>
    %c0_58 = arith.constant 0 : index
    %c0_59 = arith.constant 0 : index
    %121 = vector.load %arg13[%c0_58, %c0_59] : memref<1x128xf32, #tpu.memory_space<vmem>>, vector<1x128xf32>
    %122 = vector.broadcast %121 : vector<1x128xf32> to vector<16x128xf32>
    %123 = arith.addf %120, %122 : vector<16x128xf32>
    %124 = vector.shape_cast %123 : vector<16x128xf32> to vector<2x8x128xf32>
    %c0_60 = arith.constant 0 : index
    %c0_61 = arith.constant 0 : index
    %c0_62 = arith.constant 0 : index
    %125 = vector.load %arg14[%c0_60, %c0_61, %c0_62] : memref<2x8x128xf32, #tpu.memory_space<vmem>>, vector<2x8x128xf32>
    tpu.vector_store %arg14[%c0_60, %c0_61, %c0_62], %124 {strides = array<i32>} : memref<2x8x128xf32, #tpu.memory_space<vmem>>, vector<2x8x128xf32>,
    return
  }
  func.func @transform_0(%arg0: i32) -> (i32, i32, i32) {
    %c0_i32 = arith.constant 0 : i32
    %c0_i32_0 = arith.constant 0 : i32
    %c0_i32_1 = arith.constant 0 : i32
    return %arg0, %c0_i32, %c0_i32_0 : i32, i32, i32
  }
  func.func @transform_1(%arg0: i32) -> (i32, i32, i32) {
    %c0_i32 = arith.constant 0 : i32
    %c0_i32_0 = arith.constant 0 : i32
    %c0_i32_1 = arith.constant 0 : i32
    return %arg0, %c0_i32, %c0_i32_0 : i32, i32, i32
  }
  func.func @transform_2(%arg0: i32) -> (i32, i32, i32) {
    %c0_i32 = arith.constant 0 : i32
    %c0_i32_0 = arith.constant 0 : i32
    %c0_i32_1 = arith.constant 0 : i32
    return %arg0, %c0_i32, %c0_i32_0 : i32, i32, i32
  }
  func.func @transform_3(%arg0: i32) -> (i32, i32) {
    %c0_i32 = arith.constant 0 : i32
    %c0_i32_0 = arith.constant 0 : i32
    %c0_i32_1 = arith.constant 0 : i32
    return %c0_i32, %c0_i32_0 : i32, i32
  }
  func.func @transform_4(%arg0: i32) -> (i32, i32) {
    %c0_i32 = arith.constant 0 : i32
    %c0_i32_0 = arith.constant 0 : i32
    %c0_i32_1 = arith.constant 0 : i32
    return %c0_i32, %c0_i32_0 : i32, i32
  }
  func.func @transform_5(%arg0: i32) -> (i32, i32) {
    %c0_i32 = arith.constant 0 : i32
    %c0_i32_0 = arith.constant 0 : i32
    %c0_i32_1 = arith.constant 0 : i32
    return %c0_i32, %c0_i32_0 : i32, i32
  }
  func.func @transform_6(%arg0: i32) -> (i32, i32) {
    %c0_i32 = arith.constant 0 : i32
    %c0_i32_0 = arith.constant 0 : i32
    %c0_i32_1 = arith.constant 0 : i32
    return %c0_i32, %c0_i32_0 : i32, i32
  }
  func.func @transform_7(%arg0: i32) -> (i32, i32) {
    %c0_i32 = arith.constant 0 : i32
    %c0_i32_0 = arith.constant 0 : i32
    %c0_i32_1 = arith.constant 0 : i32
    return %c0_i32, %c0_i32_0 : i32, i32
  }
  func.func @transform_8(%arg0: i32) -> (i32, i32) {
    %c0_i32 = arith.constant 0 : i32
    %c0_i32_0 = arith.constant 0 : i32
    %c0_i32_1 = arith.constant 0 : i32
    return %c0_i32, %c0_i32_0 : i32, i32
  }
  func.func @transform_9(%arg0: i32) -> (i32, i32) {
    %c0_i32 = arith.constant 0 : i32
    %c0_i32_0 = arith.constant 0 : i32
    %c0_i32_1 = arith.constant 0 : i32
    return %c0_i32, %c0_i32_0 : i32, i32
  }
  func.func @transform_10(%arg0: i32) -> (i32, i32) {
    %c0_i32 = arith.constant 0 : i32
    %c0_i32_0 = arith.constant 0 : i32
    %c0_i32_1 = arith.constant 0 : i32
    return %c0_i32, %c0_i32_0 : i32, i32
  }
  func.func @transform_11(%arg0: i32) -> (i32, i32) {
    %c0_i32 = arith.constant 0 : i32
    %c0_i32_0 = arith.constant 0 : i32
    %c0_i32_1 = arith.constant 0 : i32
    return %c0_i32, %c0_i32_0 : i32, i32
  }
  func.func @transform_12(%arg0: i32) -> (i32, i32) {
    %c0_i32 = arith.constant 0 : i32
    %c0_i32_0 = arith.constant 0 : i32
    %c0_i32_1 = arith.constant 0 : i32
    return %c0_i32, %c0_i32_0 : i32, i32
  }
  func.func @transform_13(%arg0: i32) -> (i32, i32, i32) {
    %c0_i32 = arith.constant 0 : i32
    %c0_i32_0 = arith.constant 0 : i32
    %c0_i32_1 = arith.constant 0 : i32
    return %arg0, %c0_i32, %c0_i32_0 : i32, i32, i32
  }
}

</mosaic_0001>

<bundles_post_ra>
// kernel: tpu_custom_call.1
= control target key start
LH: loop header
LB: loop body
LE: loop exit
PB: predicated region body
PF: predicated region fallthrough
CT: control target
= control target key end

     0   :  { %s3210_s0 = inlined_call_operand.hbm [shape: f32[4,8,16], index: 0, kind: input, shape index: {}]   ;;  %s3211_s1 = inlined_call_operand.hbm [shape: f32[4,8,12], index: 1, kind: input, shape index: {}]   ;;  %s3212_s2 = inlined_call_operand.hbm [shape: f32[4,8,24], index: 2, kind: input, shape index: {}]   ;;  %s3213_s3 = inlined_call_operand.hbm [shape: bf16[16,128], index: 3, kind: input, shape index: {}]   ;;  %s3214_s4 = inlined_call_operand.hbm [shape: f32[1,128], index: 4, kind: input, shape index: {}]   ;;  %s3215_s5 = inlined_call_operand.hbm [shape: bf16[12,128], index: 5, kind: input, shape index: {}]   ;;  %s3216_s6 = inlined_call_operand.hbm [shape: f32[1,128], index: 6, kind: input, shape index: {}]   ;;  %s3217_s7 = inlined_call_operand.vmem [shape: bf16[24,128], index: 7, kind: input, shape index: {}]   ;;  %s3218_s8 = inlined_call_operand.vmem [shape: f32[1,128], index: 8, kind: input, shape index: {}]   ;;  %s3219_s9 = inlined_call_operand.hbm [shape: bf16[128,128], index: 9, kind: input, shape index: {}]   ;;  %s3220_s10 = inlined_call_operand.hbm [shape: bf16[128,256], index: 10, kind: input, shape index: {}]   ;;  %s3221_s11 = inlined_call_operand.hbm [shape: bf16[128,128], index: 11, kind: input, shape index: {}]   ;;  %s3222_s12 = inlined_call_operand.vmem [shape: f32[1,128], index: 12, kind: input, shape index: {}]   ;;  %s3223_s13 = inlined_call_operand.hbm [shape: f32[4,8,128], index: 13, kind: output, shape index: {}]  }
   0x1   :  { %3249 = sst [smem:[#allocation34_spill]] %s3211_s1 }
   0x2   :  { %3250 = sst [smem:[#allocation35_spill]] %s3213_s3 }
   0x3   :  { %3251 = sst [smem:[#allocation36_spill]] %s3214_s4 }
   0x4   :  { %3252 = sst [smem:[#allocation37_spill]] %s3215_s5 }
   0x5   :  { %3253 = sst [smem:[#allocation38_spill]] %s3219_s9 }
   0x6   :  { %3254 = sst [smem:[#allocation39_spill]] %s3222_s12 }
   0x7   :  { %3255 = sst [smem:[#allocation40_spill]] %s3223_s13 }
   0x8   :  { %18 = vsyncpa [#allocation4], 0 }
   0x9   :  { %20 = vsyncpa [#allocation4 + $0x1], 0 }
   0xa   :  { %21 = vsyncpa [#allocation7], 0 }
   0xb   :  { %23 = vsyncpa [#allocation7 + $0x1], 0 }
   0xc   :  { %24 = vsyncpa [#allocation10], 0 }
   0xd   :  { %25 = vsyncpa [#allocation13], 0 }
   0xe   :  { %26 = vsyncpa [#allocation16], 0 }
   0xf   :  { %27 = vsyncpa [#allocation19], 0 }
  0x10   :  { %28 = vsyncpa [#allocation5], 0 }
  0x11   :  { %30 = vsyncpa [#allocation5 + $0x1], 0  ;;  %s2724_s25 = smov 0   ;;  %s2726_s26 = smov 0  }
  0x12   :  { %s2728_s27 = smov 0   ;;  %s2730_s28 = smov 0  }
  0x13 LB: > { %3256 = sst [smem:[#allocation28_spill]] %s2620_s25  ;;  %s2634_s29 = smov [#allocation9]   ;;  %s2632_s28 = sphi %s2730_s28, %s3302_s28   ;;  %s2628_s27 = sphi %s2728_s27, %s3306_s27   ;;  %s2624_s26 = sphi %s2726_s26, %s3305_s26   ;;  %s2620_s25 = sphi %s2724_s25, %s3304_s25  }
  0x14   : > { %3257 = sst [smem:[#allocation29_spill]] %s2632_s28  ;;  %s367_s30 = sshll.u32 %s2634_s29, 4  ;;  %s368_s30 = int_to_ptr.vmem [resolvable:$true] %s367_s30 }
  0x15   : > { %s2745_s14 = sadd.s32 4294967295, %s2632_s28   ;;  %p1855_p0 = scmp.ge.s32.totalorder %s2632_s28, 1 }
  0x16   : > { %p3236_p1 = scmp.eq.s32.totalorder %s2745_s14, 0  ;;  %p355_p2 = scmp.lt.s32.totalorder %s2632_s28, 3 }
  0x17   : > { %s2635_s16 = smov [#allocation12]   ;;  %s2636_s19 = smov [#allocation15]  }
  0x18   : > { %p2750_p3 = pnand %p1855_p0, %p355_p2  ;;  %s391_s17 = sshll.u32 %s2635_s16, 4  ;;  %s2763_s17 = int_to_ptr.vmem [resolvable:$true] %s391_s17 }
  0x19   : > { %s421_s20 = sshll.u32 %s2636_s19, 4  ;;  %s2293_s22 = scalar_lea.vmem %s368_s30, 128  ;;  %s2765_s20 = int_to_ptr.vmem [resolvable:$true] %s421_s20 }
  0x1a   : > { %s3258_s15 = scalar_select %p2750_p3, 1, 0 }
  0x1b   : > { %p2126_p5 = pneg %p2750_p3  ;;  %p2294_p8 = scmp.ne.s32.totalorder %s368_s30, %s2293_s22 }
  0x1c   : > { %p2301_p11 = scmp.lt.s32.totalorder %s368_s30, %s368_s30  ;;  %p2302_p12 = scmp.lt.s32.totalorder %s2293_s22, %s2293_s22 }
  0x1d   : > { %p2759_p6 = pnand %p2126_p5, %p3236_p1 }
  0x1e   : > { %p2303_p13 = por %p2302_p12, %p2301_p11 }
  0x1f   : > { %s3259_s18 = scalar_select %p2759_p6, 1, 0 }
  0x20   : > { %p2769_p7 = pneg %p2759_p6 }
  0x22   : > { %s3260_s21 = scalar_select %p2769_p7, 1, 0 }
  0x23   : > { %p2296_p9 = pnand %p2294_p8, %p2769_p7 }
  0x25   : > { %p2297_p10 = pneg %p2296_p9 }
  0x27   : > { %p2304_p0 = pnand %p2303_p13, %p2297_p10 }
  0x29   : > { %2307 = shalt.err (!%p2304_p0)
}
  0x2a   : > { %s3224_s23 = smov 64   ;;  %s3226_s24 = smov 4  }
  0x2b   : > { %s3261_s3 = sld [smem:[#allocation35_spill]]  ;;  %s2319_s19 = scalar_lea.vmem %s2763_s17, 128 }
  0x2c   : > { %p2320_p2 = scmp.ne.s32.totalorder %s2763_s17, %s2319_s19  ;;  %p2327_p9 = scmp.lt.s32.totalorder %s2763_s17, %s2763_s17 }
  0x2d   : > { %p2328_p10 = scmp.lt.s32.totalorder %s2319_s19, %s2319_s19 }
  0x2e   : > { %p2322_p5 = pnand %p2320_p2, %p2769_p7 }
  0x2f   : > { %p2329_p11 = por %p2328_p10, %p2327_p9 }
  0x30   : > { %p2323_p8 = pneg %p2322_p5 }
  0x31   : > { %2129 = dma.hbm_to_vmem [thread:$0]  (!%p2759_p6), %s3261_s3, 128, %s368_s30, [#allocation10], %s3224_s23, %s3224_s23, %s3226_s24  }
  0x32   : > { %p2330_p12 = pnand %p2329_p11, %p2323_p8 }
  0x34   : > { %2333 = shalt.err (!%p2330_p12)
}
  0x35   : > { %s3262_s5 = sld [smem:[#allocation37_spill]]  ;;  %s2345_s30 = scalar_lea.vmem %s2765_s20, 1024 }
  0x36   : > { %p2346_p13 = scmp.ne.s32.totalorder %s2765_s20, %s2345_s30  ;;  %p2353_p5 = scmp.lt.s32.totalorder %s2765_s20, %s2765_s20 }
  0x37   : > { %p2354_p8 = scmp.lt.s32.totalorder %s2345_s30, %s2345_s30 }
  0x38   : > { %p2348_p0 = pnand %p2346_p13, %p2769_p7 }
  0x39   : > { %p2355_p9 = por %p2354_p8, %p2353_p5 }
  0x3a   : > { %p2349_p2 = pneg %p2348_p0 }
  0x3b   : > { %2135 = dma.hbm_to_vmem [thread:$0]  (!%p2759_p6), %s3262_s5, 128, %s2763_s17, [#allocation13], %s3224_s23, %s3224_s23, %s3226_s24  }
  0x3c   : > { %p2356_p10 = pnand %p2355_p9, %p2349_p2 }
  0x3e   : > { %2359 = shalt.err (!%p2356_p10)
}
  0x3f   : > { %s3263_s9 = sld [smem:[#allocation38_spill]]  ;;  %s1854_s17 = sadd.s32 4294967294, %s2632_s28  }
  0x40   : > { %s2815_s22 = sadd.s32 1, %s2632_s28   ;;  %s43_s29 = sadd.s32 1, %s2628_s27 }
  0x41   : > { %3264 = sst [smem:[#allocation30_spill]] %s2815_s22  ;;  %s40_s30 = ssub.s32 %s2632_s28, %s2815_s22 }
  0x42   : > { %p50_p11 = scmp.ne.s32.totalorder %s2628_s27, %s2624_s26  ;;  %p41_p12 = scmp.eq.s32.totalorder %s40_s30, 0 }
  0x43   : > { %p51_p13 = scmp.eq.s32.totalorder %s2632_s28, 0  ;;  %p56_p0 = scmp.ne.s32.totalorder %s2624_s26, %s2620_s25 }
  0x44   : > { %p342_p2 = scmp.eq.s32.totalorder %s2745_s14, 1  ;;  %p348_p10 = scmp.eq.s32.totalorder %s1854_s17, 1 }
  0x45   : > { %2141 = dma.hbm_to_vmem [thread:$0]  (!%p2759_p6), %s3263_s9, 1024, %s2765_s20, [#allocation16], %s3224_s23, %s3224_s23, %s3226_s24  }
  0x46   : > { %s2827_s16 = scalar_select %p41_p12, %s2628_s27, %s43_s29  }
  0x47   : > { %p52_p5 = por %p51_p13, %p50_p11  ;;  %p2831_p8 = por %p3236_p1, %p56_p0 }
  0x48   : > { %3265 = sst [smem:[#allocation31_spill]] %s2827_s16  ;;  %p2835_p9 = por %p342_p2, %p50_p11 }
  0x49   : > { %s3266_s20 = scalar_select %p2831_p8, 1, 0 }
  0x4a   : > { %s3267_s19 = scalar_select %p2835_p9, 1, 0 }
  0x4b   : > { %p2839_p4 = por %p348_p10, %p56_p0  ;;  %p2169_p3 = scmp.lt.s32.totalorder %s2632_s28, 2 }
  0x4c   : > { %3268 = sst [smem:[#allocation32_spill]] %s3267_s19  ;;  %s3230_s30 = sand.u32 1, %s2628_s27  }
  0x4d   : > { %s3269_s23 = scalar_select %p2839_p4, 1, 0 }
  0x4e   : > { %s2846_s24 = sshll.u32 %s2632_s28, 8  ;;  %s2850_s29 = sshll.u32 %s3230_s30, 4 }
  0x4f   : > { %3270 = sst [smem:[#allocation33_spill]] %s3269_s23  ;;  %p2852_p12 = pnand %p2169_p3, %p52_p5 }
  0x50   : > { %s485_s5 = sand.u32 1, %s2632_s28   ;;  %s3272_s1 = sld [smem:[#allocation34_spill]] }
  0x51   : > { %s3271_s3 = scalar_select %p2852_p12, 1, 0 }
  0x52   : > { %s489_s22 = scalar_lea.vmem [#allocation6], %s2850_s29  ;;  %s2866_s30 = scalar_lea.sflag [#allocation7], %s485_s5 }
  0x53   : > { %s496_s23 = sshll.u32 %s489_s22, 4  ;;  %p2872_p11 = pneg %p2852_p12  ;;  %s2864_s23 = int_to_ptr.vmem [resolvable:$true] %s496_s23 }
  0x56   : > { %s2861_s16 = scalar_lea.hbm %s3272_s1, %s2846_s24  ;;  %s2365_s28 = scalar_lea.hbm %s3272_s1, 512 }
  0x57   : > { %s2360_s25 = scalar_lea.hbm %s2861_s16, 256  ;;  %p2366_p2 = scmp.lt.s32.totalorder %s2861_s16, %s3272_s1 }
  0x58   : > { %p2361_p3 = scmp.ne.s32.totalorder %s2861_s16, %s2360_s25  ;;  %p2367_p5 = scmp.lt.s32.totalorder %s2365_s28, %s2360_s25 }
  0x5a   : > { %p2363_p13 = pnand %p2872_p11, %p2361_p3  ;;  %p2368_p10 = por %p2367_p5, %p2366_p2 }
  0x5c   : > { %p2364_p0 = pneg %p2363_p13 }
  0x5e   : > { %p2369_p1 = pnand %p2368_p10, %p2364_p0 }
  0x60   : > { %2372 = shalt.err (!%p2369_p1)
}
  0x61   : > { %s2373_s5 = scalar_lea.vmem %s2864_s23, 256  ;;  %s2639_s12 = smov [#allocation6]  }
  0x62   : > { %p2374_p4 = scmp.ne.s32.totalorder %s2864_s23, %s2373_s5  ;;  %s2378_s9 = sshll.u32 %s2639_s12, 4  ;;  %s2379_s9 = int_to_ptr.vmem [resolvable:$false] %s2378_s9 }
  0x63   : > { %s2380_s17 = scalar_lea.vmem %s2379_s9, 512  ;;  %p2381_p9 = scmp.lt.s32.totalorder %s2864_s23, %s2379_s9 }
  0x64   : > { %p2376_p3 = pnand %p2374_p4, %p2872_p11  ;;  %p2382_p8 = scmp.lt.s32.totalorder %s2380_s17, %s2373_s5 }
  0x66   : > { %p2377_p13 = pneg %p2376_p3  ;;  %p2383_p6 = por %p2382_p8, %p2381_p9 }
  0x68   : > { %p2384_p7 = pnand %p2383_p6, %p2377_p13 }
  0x6a   : > { %2387 = shalt.err (!%p2384_p7)
}
  0x6b   : > { %s3245_s25 = smov 128   ;;  %s3247_s28 = smov 8  }
  0x6c   : > { %2154 = dma.hbm_to_vmem [thread:$0]  (!%p2852_p12), %s2861_s16, 256, %s2864_s23, %s2866_s30, %s3245_s25, %s3245_s25, %s3247_s28  }
  0x6d   : > { %s2642_s12 = smov [#allocation11]   ;;  %s2643_s22 = smov [#allocation14]  }
  0x6e   : > { %s381_s19 = sshll.u32 %s2642_s12, 4  ;;  %s405_s5 = sshll.u32 %s2643_s22, 4  ;;  %s382_s19 = int_to_ptr.vmem [resolvable:$true] %s381_s19  ;;  %s406_s5 = int_to_ptr.vmem [resolvable:$true] %s405_s5 }
  0x6f   : > { %s2399_s9 = scalar_lea.vmem %s382_s19, 16  ;;  %p3274_p4 = scmp.ne.s32.totalorder %s3260_s21, 0 }
  0x70   : > { %p2400_p1 = scmp.ne.s32.totalorder %s382_s19, %s2399_s9  ;;  %s2406_s17 = scalar_lea.vmem %s382_s19, 32 }
  0x71   : > { %p2407_p8 = scmp.lt.s32.totalorder %s382_s19, %s382_s19  ;;  %p2408_p9 = scmp.lt.s32.totalorder %s2406_s17, %s2399_s9 }
  0x72   : > { %p2402_p6 = pnand %p2400_p1, %p3274_p4 }
  0x73   : > { %p2409_p0 = por %p2408_p9, %p2407_p8 }
  0x74   : > { %p2403_p7 = pneg %p2402_p6 }
  0x76   : > { %p2410_p2 = pnand %p2409_p0, %p2403_p7 }
  0x78   : > { %2413 = shalt.err (!%p2410_p2)
}
  0x79   : > { %p3275_p5 = scmp.ne.s32.totalorder %s3259_s18, 0  ;;  %s3276_s4 = sld [smem:[#allocation36_spill]] }
  0x7a   : > { %s2425_s16 = scalar_lea.vmem %s406_s5, 16  ;;  %s2432_s12 = scalar_lea.vmem %s406_s5, 32 }
  0x7b   : > { %p2426_p10 = scmp.ne.s32.totalorder %s406_s5, %s2425_s16  ;;  %p2433_p1 = scmp.lt.s32.totalorder %s406_s5, %s406_s5 }
  0x7c   : > { %p2434_p6 = scmp.lt.s32.totalorder %s2432_s12, %s2425_s16 }
  0x7d   : > { %p2428_p3 = pnand %p2426_p10, %p3274_p4 }
  0x7e   : > { %p2435_p12 = por %p2434_p6, %p2433_p1 }
  0x7f   : > { %2132 = dma.hbm_to_vmem [thread:$0]  (!%p3275_p5), %s3276_s4, 16, %s382_s19, [#allocation10]  }
  0x80   : > { %p2429_p13 = pneg %p2428_p3 }
  0x82   : > { %p2436_p8 = pnand %p2435_p12, %p2429_p13 }
  0x84   : > { %2439 = shalt.err (!%p2436_p8)
}
  0x85   : > { %2138 = dma.hbm_to_vmem [thread:$0]  (!%p3275_p5), %s3216_s6, 16, %s406_s5, [#allocation13]  }
  0x86   : > { %s2644_s1 = smov [#allocation17]   ;;  %s2645_s17 = smov [#allocation18]  }
  0x87   : > { %s434_s19 = sshll.u32 %s2644_s1, 4  ;;  %s447_s23 = sshll.u32 %s2645_s17, 4  ;;  %s435_s19 = int_to_ptr.vmem [resolvable:$true] %s434_s19  ;;  %s448_s23 = int_to_ptr.vmem [resolvable:$true] %s447_s23 }
  0x88   : > { %s2451_s25 = scalar_lea.vmem %s435_s19, 2048  ;;  %p2459_p2 = scmp.lt.s32.totalorder %s435_s19, %s435_s19 }
  0x89   : > { %p2452_p7 = scmp.ne.s32.totalorder %s435_s19, %s2451_s25  ;;  %p2460_p12 = scmp.lt.s32.totalorder %s2451_s25, %s2451_s25 }
  0x8b   : > { %p2454_p9 = pnand %p2452_p7, %p3274_p4  ;;  %p2461_p10 = por %p2460_p12, %p2459_p2 }
  0x8d   : > { %p2455_p0 = pneg %p2454_p9 }
  0x8f   : > { %p2462_p3 = pnand %p2461_p10, %p2455_p0 }
  0x91   : > { %2465 = shalt.err (!%p2462_p3)
}
  0x92   : > { %s3277_s16 = smov 128   ;;  %s2477_s22 = scalar_lea.vmem %s448_s23, 1024 }
  0x93   : > { %2144 = dma.hbm_to_vmem [thread:$0]  (!%p3275_p5), %s3220_s10, 2048, %s435_s19, [#allocation16], %s3277_s16, %s3277_s16, %s3247_s28  }
  0x94   : > { %p2478_p13 = scmp.ne.s32.totalorder %s448_s23, %s2477_s22  ;;  %p2485_p8 = scmp.lt.s32.totalorder %s448_s23, %s448_s23 }
  0x95   : > { %p2486_p7 = scmp.lt.s32.totalorder %s2477_s22, %s2477_s22 }
  0x96   : > { %p2480_p1 = pnand %p2478_p13, %p3274_p4 }
  0x97   : > { %p2487_p9 = por %p2486_p7, %p2485_p8 }
  0x98   : > { %p2481_p6 = pneg %p2480_p1 }
  0x9a   : > { %p2488_p0 = pnand %p2487_p9, %p2481_p6 }
  0x9c   : > { %2491 = shalt.err (!%p2488_p0)
}
  0x9d   : > { %s3278_s25 = smov 4   ;;  %s3279_s9 = smov 64  }
  0x9e   : > { %2147 = dma.hbm_to_vmem [thread:$0]  (!%p3275_p5), %s3221_s11, 1024, %s448_s23, [#allocation19], %s3279_s9, %s3279_s9, %s3278_s25  }
  0x9f   : > { %s2936_s5 = scalar_lea.hbm %s3210_s0, %s2846_s24  ;;  %s468_s18 = scalar_lea.vmem [#allocation3], %s2850_s29 }
  0xa0   : > { %s475_s12 = sshll.u32 %s468_s18, 4  ;;  %s2945_s17 = scalar_lea.hbm %s3212_s2, %s2846_s24  ;;  %s2939_s12 = int_to_ptr.vmem [resolvable:$true] %s475_s12 }
  0xa1   : > { %s3280_s28 = sand.u32 1, %s2628_s27   ;;  %s2492_s23 = scalar_lea.hbm %s2936_s5, 256 }
  0xa2   : > { %s465_s4 = scalar_lea.sflag [#allocation4], %s3280_s28  ;;  %p2493_p4 = scmp.ne.s32.totalorder %s2936_s5, %s2492_s23 }
  0xa3   : > { %s2497_s21 = scalar_lea.hbm %s3210_s0, 512  ;;  %p2498_p12 = scmp.lt.s32.totalorder %s2936_s5, %s3210_s0 }
  0xa4   : > { %p2495_p5 = pnand %p2493_p4, %p2872_p11  ;;  %p2499_p10 = scmp.lt.s32.totalorder %s2497_s21, %s2492_s23 }
  0xa6   : > { %p2496_p2 = pneg %p2495_p5  ;;  %p2500_p3 = por %p2499_p10, %p2498_p12 }
  0xa8   : > { %p2501_p13 = pnand %p2500_p3, %p2496_p2 }
  0xaa   : > { %2504 = shalt.err (!%p2501_p13)
}
  0xab   : > { %s2505_s24 = scalar_lea.vmem %s2939_s12, 256  ;;  %s2646_s28 = smov [#allocation3]  }
  0xac   : > { %p2506_p1 = scmp.ne.s32.totalorder %s2939_s12, %s2505_s24  ;;  %s2510_s22 = sshll.u32 %s2646_s28, 4  ;;  %s2511_s22 = int_to_ptr.vmem [resolvable:$false] %s2510_s22 }
  0xad   : > { %s2512_s1 = scalar_lea.vmem %s2511_s22, 512  ;;  %p2513_p7 = scmp.lt.s32.totalorder %s2939_s12, %s2511_s22 }
  0xae   : > { %p2508_p6 = pnand %p2506_p1, %p2872_p11  ;;  %p2514_p9 = scmp.lt.s32.totalorder %s2512_s1, %s2505_s24 }
  0xb0   : > { %p2509_p8 = pneg %p2508_p6  ;;  %p2515_p0 = por %p2514_p9, %p2513_p7 }
  0xb2   : > { %p2516_p4 = pnand %p2515_p0, %p2509_p8 }
  0xb4   : > { %2519 = shalt.err (!%p2516_p4)
}
  0xb5   : > { %p3281_p5 = scmp.ne.s32.totalorder %s3271_s3, 0  ;;  %s3282_s23 = smov 8  }
  0xb6   : > { %s510_s25 = scalar_lea.vmem [#allocation8], %s2850_s29  ;;  %s2520_s21 = scalar_lea.hbm %s2945_s17, 256 }
  0xb7   : > { %2151 = dma.hbm_to_vmem [thread:$0]  (!%p3281_p5), %s2936_s5, 256, %s2939_s12, %s465_s4, %s3277_s16, %s3277_s16, %s3282_s23  }
  0xb8   : > { %s517_s9 = sshll.u32 %s510_s25, 4  ;;  %p2521_p2 = scmp.ne.s32.totalorder %s2945_s17, %s2520_s21  ;;  %s518_s9 = int_to_ptr.vmem [resolvable:$true] %s517_s9 }
  0xb9   : > { %s2525_s24 = scalar_lea.hbm %s3212_s2, 512  ;;  %p2526_p3 = scmp.lt.s32.totalorder %s2945_s17, %s3212_s2 }
  0xba   : > { %p2523_p12 = pnand %p2521_p2, %p2872_p11  ;;  %p2527_p13 = scmp.lt.s32.totalorder %s2525_s24, %s2520_s21 }
  0xbc   : > { %p2524_p10 = pneg %p2523_p12  ;;  %p2528_p1 = por %p2527_p13, %p2526_p3 }
  0xbe   : > { %p2529_p6 = pnand %p2528_p1, %p2524_p10 }
  0xc0   : > { %2532 = shalt.err (!%p2529_p6)
}
  0xc1   : > { %s2533_s4 = scalar_lea.vmem %s518_s9, 256  ;;  %s2647_s29 = smov [#allocation8]  }
  0xc2   : > { %p2534_p8 = scmp.ne.s32.totalorder %s518_s9, %s2533_s4  ;;  %s2538_s5 = sshll.u32 %s2647_s29, 4  ;;  %s2539_s5 = int_to_ptr.vmem [resolvable:$false] %s2538_s5 }
  0xc3   : > { %s2540_s12 = scalar_lea.vmem %s2539_s5, 512  ;;  %p2541_p0 = scmp.lt.s32.totalorder %s518_s9, %s2539_s5 }
  0xc4   : > { %p2536_p7 = pnand %p2534_p8, %p2872_p11  ;;  %p2542_p4 = scmp.lt.s32.totalorder %s2540_s12, %s2533_s4 }
  0xc6   : > { %p2537_p9 = pneg %p2536_p7  ;;  %p2543_p2 = por %p2542_p4, %p2541_p0 }
  0xc8   : > { %p2544_p12 = pnand %p2543_p2, %p2537_p9 }
  0xca   : > { %2547 = shalt.err (!%p2544_p12)
}
  0xcb   : > { %2157 = dma.hbm_to_vmem [thread:$0]  (!%p3281_p5), %s2945_s17, 256, %s518_s9, %s2866_s30, %s3277_s16, %s3277_s16, %s3282_s23  }
  0xcc   : > { %p3283_p11 = scmp.ne.s32.totalorder %s3258_s15, 0 }
  0xcd   : > { %s2996_s13 = sand.u32 (!%p3283_p11), 1, %s2624_s26   ;;  %p3284_p10 = scmp.ne.s32.totalorder (!%p3283_p11), %s3266_s20, 0 }
  0xce   : > { %529 = sbr.rel (%p3283_p11) target bundleno = 1817 (0x719), region = 72  ;;  %s2999_s1 = sshll.u32 (!%p3283_p11), %s2996_s13, 4 }
  0xcf   : > { %s532_s25 = scalar_lea.sflag (!%p3283_p11), [#allocation4], %s2996_s13  ;;  %s535_s3 = scalar_lea.vmem (!%p3283_p11), [#allocation3], %s2999_s1 }
  0xd3   : > { %2591 = dma.done.wait (%p3284_p10), %s532_s25, 256  }
  0xd4   : > { %2593 = vsyncadd (%p3284_p10), %s532_s25, 4294967040  ;;  %s540_s15 = sand.u32 1, %s2745_s14   ;;  %s544_s16 = scalar_lea.vmem [#allocation6], %s2999_s1 }
  0xd5   : > { %s541_s30 = scalar_lea.sflag [#allocation7], %s540_s15 }
  0xd6   : > { %2595 = dma.done.wait (%p3284_p10), %s541_s30, 512  }
  0xd7   : > { %2597 = vsyncadd (%p3284_p10), %s541_s30, 4294966784  ;;  %s553_s17 = scalar_lea.vmem [#allocation8], %s2999_s1  ;;  %p3285_p5 = scmp.eq.s32.totalorder %s2745_s14, 0 }
  0xd9   : > { %2599 = dma.done.wait (%p3285_p5), [#allocation10], 144   ;;  %p3286_p3 = pmov %p3285_p5 }
  0xdb   : > { %2601 = vsyncadd (%p3286_p3), [#allocation10], 4294967152  ;;  %p3287_p13 = pmov %p3286_p3 }
  0xdc   : > { %p3288_p1 = pmov %p3286_p3 }
  0xdd   : > { %2603 = dma.done.wait (%p3287_p13), [#allocation13], 144  }
  0xde   : > { %2605 = vsyncadd (%p3288_p1), [#allocation13], 4294967152  ;;  %p3289_p6 = pmov %p3288_p1 }
  0xdf   : > { %p3290_p8 = pmov %p3288_p1 }
  0xe0   : > { %2607 = dma.done.wait (%p3289_p6), [#allocation16], 3072  }
  0xe1   : > { %2609 = vsyncadd (%p3290_p8), [#allocation16], 4294964224  ;;  %p3291_p7 = pmov %p3288_p1 }
  0xe2   : > { %p3292_p9 = pmov %p3288_p1 }
  0xe3   : > { %2611 = dma.done.wait (%p3291_p7), [#allocation19], 1024  }
  0xe4   : > { %2613 = vsyncadd (%p3292_p9), [#allocation19], 4294966272  ;;  %v2648_v0 = vmov 0.0   ;;  %vm2649_vm0 = vmmov 0   ;;  %v2226_v1 = vld [vmem:[#allocation9] sm:$0xff]   ;;  %vm728_vm1 = vcmask 1045504  }
  0xe5   : > { %1982 = vmatprep.subr.bf16.mxu0 %v2648_v0  ;;  %1988 = vmatprep.subr.bf16.mxu1 %v2648_v0  ;;  %v2227_v2 = vld [vmem:[#allocation12] sm:$0x3f]   ;;  %v639_v3 = vld [vmem:[%s535_s3] sm:$0xff]  ;;  %vm663_vm2 = vcmask 130048   ;;  %vm798_vm3 = vcmask 1043456   ;;  %vm724_vm4 = vcmask 97280  }
  0xe6   : > { %1984 = vmatprep.mubr.msk.bf16.mxu0 %vm2649_vm0, %v2648_v0  ;;  %1990 = vmatprep.mubr.msk.bf16.mxu1 %vm2649_vm0, %v2648_v0  ;;  %v640_v4 = vld [vmem:[%s535_s3 + $0x8] sm:$0xff]  ;;  %v642_v5 = vld [vmem:[%s544_s16] sm:$0xff]  ;;  %v730_v6 = vsel %vm728_vm1, %v2227_v2, 0  ;;  %vm794_vm5 = vcmask 195584   ;;  %v2650_v40 = vmov 0   ;;  %vm1218_vm6 = vcmask 64512  }
  0xe7   : > { %1983 = vmatpush3.bf16.msra.mxu0 %v2226_v1  ;;  %v641_v7 = vpack.c.bf16 %v640_v4, %v639_v3  ;;  %v643_v8 = vld [vmem:[%s544_s16 + $0x8] sm:$0xff]  ;;  %1989 = vmatpush3.bf16.msra.mxu1 %v730_v6  ;;  %v2229_v11 = vld [vmem:[%s3217_s7] sm:$0xff]   ;;  %v1888_v43 = vld [vmem:[#allocation14] ss:$0 sm:$0xff]  ;;  %s3293_s22 = sld [smem:[#allocation39_spill]]  ;;  %s633_s29 = scalar_lea.vmem [#allocation20], %s2999_s1 }
  0xe8   : > { %1994 = vmatprep.subr.bf16.mxu0 %v2648_v0  ;;  %v2228_v9 = vld [vmem:[%s3217_s7 + $0x8] ss:$0 sps:$4 sm:$0xff]   ;;  %v644_v10 = vpack.c.bf16 %v643_v8, %v642_v5  ;;  %v645_v13 = vld [vmem:[%s553_s17] sm:$0xff]  ;;  %2002 = vmatprep.subr.bf16.mxu1 %v2648_v0  ;;  %s3294_s4 = sld [smem:[#allocation32_spill]]  ;;  %s1671_s5 = sshll.u32 %s633_s29, 4  ;;  %s3162_s5 = int_to_ptr.vmem [resolvable:$true] %s1671_s5 }
  0xe9   : > { %v800_v12 = vsel %vm798_vm3, %v2228_v9, 0  ;;  %v646_v14 = vld [vmem:[%s553_s17 + $0x8] sm:$0xff]  ;;  %v1891_v2 = vld [vmem:[%s3218_s8] ss:$0 sm:$0xff]  ;;  %s1940_s12 = sshll.u32 %s2745_s14, 8  ;;  %s3295_s15 = sld [smem:[#allocation40_spill]] }
  0xea   : > { %1985 = vmatmul.mubr.msk.bf16.vlgmr.msra.gmra.mxu0 %vm663_vm2, %v641_v7  ;;  %v2230_v15 = vld [vmem:[#allocation15 + $0x38] sm:$0xff]   ;;  %1991 = vmatmul.mubr.msk.bf16.vlgmr.msra.gmra.mxu1 %vm724_vm4, %v644_v10  ;;  %v2234_v17 = vld [vmem:[#allocation15 + $0x30] sm:$0xff]   ;;  %v647_v18 = vpack.c.bf16 %v646_v14, %v645_v13  ;;  %v3057_v20 = vld [vmem:[#allocation17 + $0x64] ss:$8 sps:$4 sm:$0xff]   ;;  %s1658_s1 = scalar_lea.sflag [#allocation5], %s2996_s13  ;;  %s2548_s16 = scalar_lea.vmem %s3162_s5, 256 }
  0xeb   : > { %1995 = vmatpush3.bf16.msra.mxu0 %v800_v12  ;;  %1998 = vmatprep.mubr.msk.bf16.mxu0 %vm2649_vm0, %v2648_v0  ;;  %v2233_v16 = vld [vmem:[#allocation17 + $0x74] ss:$8 sps:$4 sm:$0xff]   ;;  %v3055_v19 = vld [vmem:[#allocation17 + $0x70] ss:$8 sps:$4 sm:$0xff]   ;;  %v2238_v21 = vld [vmem:[#allocation15 + $0x28] sm:$0xff]   ;;  %p2549_p0 = scmp.ne.s32.totalorder %s3162_s5, %s2548_s16  ;;  %s2651_s14 = smov [#allocation20]  }
  0xec   : > { %1996 = vmatprep.subr.bf16.mxu0 %v2648_v0  ;;  %2003 = vmatpush3.bf16.msra.mxu1 %v2230_v15  ;;  %v3061_v22 = vld [vmem:[#allocation17 + $0x60] ss:$8 sps:$4 sm:$0xff]   ;;  %v3064_v23 = vld [vmem:[#allocation17 + $0x54] ss:$8 sps:$4 sm:$0xff]   ;;  %v3066_v25 = vld [vmem:[#allocation17 + $0x50] ss:$8 sps:$4 sm:$0xff]  }
  0xed   : > { %2018 = vmatprep.mubr.msk.bf16.mxu1 %vm2649_vm0, %v2648_v0  ;;  %2004 = vmatprep.subr.bf16.mxu1 %v2648_v0  ;;  %v2242_v24 = vld [vmem:[#allocation15 + $0x20] sm:$0xff]   ;;  %v2246_v27 = vld [vmem:[#allocation15 + $0x18] sm:$0xff]   ;;  %v2250_v30 = vld [vmem:[#allocation15 + $0x10] sm:$0xff]   ;;  %s2552_s17 = sshll.u32 %s2651_s14, 4  ;;  %s2553_s17 = int_to_ptr.vmem [resolvable:$false] %s2552_s17 }
  0xee   : > { %v3070_v26 = vld [vmem:[#allocation17 + $0x44] ss:$8 sps:$4 sm:$0xff]   ;;  %v3073_v28 = vld [vmem:[#allocation17 + $0x40] ss:$8 sps:$4 sm:$0xff]   ;;  %v3076_v29 = vld [vmem:[#allocation17 + $0x34] ss:$8 sps:$4 sm:$0xff]   ;;  %p2555_p11 = scmp.lt.s32.totalorder %s3162_s5, %s2553_s17 }
  0xef   : > { %1997 = vmatpush3.bf16.msra.mxu0 %v2229_v11  ;;  %v3080_v31 = vld [vmem:[#allocation17 + $0x30] ss:$8 sps:$4 sm:$0xff]   ;;  %v2253_v32 = vld [vmem:[#allocation17 + $0x24] ss:$8 sps:$4 sm:$0xff]   ;;  %v2251_v33 = vld [vmem:[#allocation17 + $0x20] ss:$8 sps:$4 sm:$0xff]   ;;  %s3167_s30 = scalar_lea.hbm %s3295_s15, %s1940_s12 }
  0xf0   : > { %1048 = vmatprep.subr.bf16.mxu0 %v2233_v16  ;;  %2005 = vmatpush3.bf16.msra.mxu1 %v2234_v17  ;;  %v2254_v34 = vld [vmem:[#allocation15 + $0x8] sm:$0xff]   ;;  %v2257_v35 = vld [vmem:[#allocation17 + $0x14] ss:$8 sps:$4 sm:$0xff]   ;;  %v2255_v36 = vld [vmem:[#allocation17 + $0x10] ss:$8 sps:$4 sm:$0xff]   ;;  %p3296_p4 = scmp.ne.s32.totalorder %s3294_s4, 0 }
  0xf1   : > { %2006 = vmatprep.subr.bf16.mxu1 %v2648_v0  ;;  %v2258_v37 = vld [vmem:[#allocation15] sm:$0xff]   ;;  %v1885_v41 = vld [vmem:[#allocation11] ss:$0 sm:$0xff]  ;;  %s2554_s20 = scalar_lea.vmem %s2553_s17, 512 }
  0xf2   : > { %1999 = vmatmul.mubr.msk.bf16.vlgmr.msra.gmra.mxu0 %vm794_vm5, %v647_v18  ;;  %v2261_v38 = vld [vmem:[#allocation17 + $0x4] ss:$8 sps:$4 sm:$0xff]   ;;  %v2259_v39 = vld [vmem:[#allocation17] ss:$8 sps:$4 sm:$0xff]   ;;  %p2550_p2 = pnand %p2549_p0, %p3296_p4  ;;  %p2556_p10 = scmp.lt.s32.totalorder %s2554_s20, %s2548_s16 }
  0xf3   : > { %1049 = vmatpush1.bf16.msra.mxu0 %v3055_v19  ;;  %1080 = vmatprep.mubr.bf16.mxu0 %v2650_v40 }
  0xf4   : > { %1050 = vmatprep.subr.bf16.mxu0 %v3057_v20  ;;  %2007 = vmatpush3.bf16.msra.mxu1 %v2238_v21  ;;  %p2551_p12 = pneg %p2550_p2  ;;  %p2557_p5 = por %p2556_p10, %p2555_p11 }
  0xf5   : > { %2008 = vmatprep.subr.bf16.mxu1 %v2648_v0 }
  0xf6   : > { %p2558_p3 = pnand %p2557_p5, %p2551_p12 }
  0xf7   : > { %1051 = vmatpush1.bf16.msra.mxu0 %v3061_v22 }
  0xf8   : > { %1052 = vmatprep.subr.bf16.mxu0 %v3064_v23  ;;  %2009 = vmatpush3.bf16.msra.mxu1 %v2242_v24 }
  0xf9   : > { %2010 = vmatprep.subr.bf16.mxu1 %v2648_v0 }
  0xfb   : > { %1053 = vmatpush1.bf16.msra.mxu0 %v3066_v25 }
  0xfc   : > { %1054 = vmatprep.subr.bf16.mxu0 %v3070_v26  ;;  %2011 = vmatpush3.bf16.msra.mxu1 %v2246_v27 }
  0xfd   : > { %2012 = vmatprep.subr.bf16.mxu1 %v2648_v0 }
  0xff   : > { %1055 = vmatpush1.bf16.msra.mxu0 %v3073_v28 }
 0x100   : > { %1056 = vmatprep.subr.bf16.mxu0 %v3076_v29  ;;  %2013 = vmatpush3.bf16.msra.mxu1 %v2250_v30 }
 0x101   : > { %2014 = vmatprep.subr.bf16.mxu1 %v2648_v0 }
 0x103   : > { %1057 = vmatpush1.bf16.msra.mxu0 %v3080_v31 }
 0x104   : > { %1058 = vmatprep.subr.bf16.mxu0 %v2253_v32  ;;  %2015 = vmatpush3.bf16.msra.mxu1 %v2254_v34 }
 0x105   : > { %2016 = vmatprep.subr.bf16.mxu1 %v2648_v0 }
 0x107   : > { %1059 = vmatpush1.bf16.msra.mxu0 %v2251_v33 }
 0x108   : > { %1060 = vmatprep.subr.bf16.mxu0 %v2257_v35  ;;  %2017 = vmatpush3.bf16.msra.mxu1 %v2258_v37 }
 0x109   : > { %1092 = vmatprep.subr.bf16.mxu1 %v2233_v16 }
 0x10b   : > { %1061 = vmatpush1.bf16.msra.mxu0 %v2255_v36 }
 0x10c   : > { %1062 = vmatprep.subr.bf16.mxu0 %v2261_v38 }
 0x10f   : > { %1063 = vmatpush1.bf16.msra.mxu0 %v2259_v39 }
 0x110   : > { %2022 = vmatprep.subr.bf16.mxu0 %v2648_v0 }
 0x1aa   : > { %v701_v42 = vpop.f32.mrf.mxu0  ;;  %v766_v44 = vpop.f32.mrf.mxu1 }
 0x1ab   : > { %v702_v46 = vadd.f32 %v1885_v41, %v701_v42  ;;  %v767_v47 = vadd.f32 %v1888_v43, %v766_v44 }
 0x1ac   : > { %v1986_v45 = vpop.f32.mrf.mxu0  ;;  %v1992_v48 = vpop.f32.mrf.mxu1 }
 0x1ad   : > { %v708_v53 = vmax.f32 %v702_v46, 0.0  ;;  %v773_v54 = vmax.f32 %v767_v47, 0.0 }
 0x1ae   : > { %v704_v49 = vpop.f32.mrf.mxu0  ;;  %v769_v51 = vpop.f32.mrf.mxu1 }
 0x1af   : > { %v705_v50 = vadd.f32 %v1885_v41, %v704_v49  ;;  %v770_v56 = vadd.f32 %v1888_v43, %v769_v51 }
 0x1b0   : > { %v1987_v52 = vpop.f32.mrf.mxu0  ;;  %v1993_v57 = vpop.f32.mrf.mxu1 }
 0x1b1   : > { %v709_v55 = vmax.f32 %v705_v50, 0.0  ;;  %v774_v60 = vmax.f32 %v770_v56, 0.0 }
 0x1b2   : > { %v836_v58 = vpop.f32.mrf.mxu0 }
 0x1b3   : > { %v845_v59 = vpack.c.bf16 %v709_v55, %v708_v53  ;;  %v951_v62 = vpack.c.bf16 %v774_v60, %v773_v54  ;;  %v837_v3 = vadd.f32 %v1891_v2, %v836_v58 }
 0x1b4   : > { %v2000_v61 = vpop.f32.mrf.mxu0 }
 0x1b5   : > { %2019 = vmatmul.mubr.bf16.vlgmr.msra.gmra.mxu1 %v845_v59  ;;  %1081 = vmatmul.mubr.bf16.vlgmr.msra.gmra.mxu0 %v951_v62  ;;  %v843_v5 = vmax.f32 %v837_v3, 0.0 }
 0x1b6   : > { %1093 = vmatpush1.bf16.msra.mxu1 %v3055_v19  ;;  %v839_v63 = vpop.f32.mrf.mxu0  ;;  %1124 = vmatprep.mubr.bf16.mxu1 %v2650_v40 }
 0x1b7   : > { %1094 = vmatprep.subr.bf16.mxu1 %v3057_v20  ;;  %2024 = vmatprep.mubr.msk.bf16.mxu0 %vm2649_vm0, %v2648_v0  ;;  %v840_v4 = vadd.f32 %v1891_v2, %v839_v63 }
 0x1b8   : > { %v2001_v1 = vpop.f32.mrf.mxu0 }
 0x1b9   : > { %v844_v6 = vmax.f32 %v840_v4, 0.0 }
 0x1ba   : > { %1095 = vmatpush1.bf16.msra.mxu1 %v3061_v22 }
 0x1bb   : > { %1096 = vmatprep.subr.bf16.mxu1 %v3064_v23  ;;  %v1091_v7 = vpack.c.bf16 %v844_v6, %v843_v5 }
 0x1be   : > { %1097 = vmatpush1.bf16.msra.mxu1 %v3066_v25 }
 0x1bf   : > { %1098 = vmatprep.subr.bf16.mxu1 %v3070_v26 }
 0x1c2   : > { %1099 = vmatpush1.bf16.msra.mxu1 %v3073_v28 }
 0x1c3   : > { %1100 = vmatprep.subr.bf16.mxu1 %v3076_v29 }
 0x1c6   : > { %1101 = vmatpush1.bf16.msra.mxu1 %v3080_v31 }
 0x1c7   : > { %1102 = vmatprep.subr.bf16.mxu1 %v2253_v32 }
 0x1ca   : > { %1103 = vmatpush1.bf16.msra.mxu1 %v2251_v33 }
 0x1cb   : > { %1104 = vmatprep.subr.bf16.mxu1 %v2257_v35 }
 0x1ce   : > { %1105 = vmatpush1.bf16.msra.mxu1 %v2255_v36 }
 0x1cf   : > { %1106 = vmatprep.subr.bf16.mxu1 %v2261_v38 }
 0x1d2   : > { %1107 = vmatpush1.bf16.msra.mxu1 %v2259_v39 }
 0x1d3   : > { %2058 = vmatprep.subr.bf16.mxu1 %v2648_v0 }
 0x1d5   : > { %1125 = vmatmul.mubr.bf16.vlgmr.msra.gmra.mxu1 %v1091_v7 }
 0x1d6   : > { %2060 = vmatprep.mubr.msk.bf16.mxu1 %vm2649_vm0, %v2648_v0 }
 0x275   : > { %v944_v8 = vpop.f32.mrf.mxu1  ;;  %v1082_v9 = vpop.f32.mrf.mxu0 }
 0x276   : > { %v1136_v11 = vpack.c.bf16 %v1082_v9, %v1082_v9  ;;  %v1135_v14 = vpack.c.bf16 %v944_v8, %v944_v8 }
 0x277   : > { %v2020_v10 = vpop.f32.mrf.mxu1  ;;  %v1084_v24 = vpop.f32.mrf.mxu0 }
 0x278   : > { %2023 = vmatpush3.bf16.xpose.msra.mxu0 %v1136_v11  ;;  %v1240_v45 = vpack.c.bf16 %v1084_v24, %v1084_v24 }
 0x279   : > { %v3106_v12 = vpop.f32.mrf.mxu1  ;;  %2028 = vmatprep.subr.bf16.mxu0 %v2648_v0  ;;  %v1086_v25 = vpop.f32.mrf.mxu0 }
 0x27a   : > { %v1293_v49 = vsel %vm798_vm3, %v1240_v45, 0  ;;  %v1339_v51 = vpack.c.bf16 %v1086_v25, %v1086_v25  ;;  %v1338_v52 = vpack.c.bf16 %v3106_v12, %v3106_v12 }
 0x27b   : > { %v2021_v13 = vpop.f32.mrf.mxu1  ;;  %v1088_v26 = vpop.f32.mrf.mxu0 }
 0x27c   : > { %v1442_v54 = vpack.c.bf16 %v1088_v26, %v1088_v26  ;;  %v2262_v26 = vld [vmem:[#allocation18 + $0x38] sm:$0xff]  }
 0x27e   : > { %v1495_v55 = vsel %vm798_vm3, %v1442_v54, 0 }
 0x27f   : > { %2025 = vmatmul.mubr.bf16.vlgmr.msra.gmra.mxu0 %v1135_v14 }
 0x280   : > { %2030 = vmatprep.mubr.msk.bf16.mxu0 %vm2649_vm0, %v2648_v0 }
 0x295   : > { %v1126_v15 = vpop.f32.mrf.mxu1 }
 0x296   : > { %v1177_v16 = vpack.c.bf16 %v1126_v15, %v1126_v15 }
 0x297   : > { %v1128_v17 = vpop.f32.mrf.mxu1 }
 0x298   : > { %2029 = vmatpush3.bf16.xpose.msra.mxu0 %v1177_v16  ;;  %v1242_v19 = vpack.c.bf16 %v1128_v17, %v1128_v17 }
 0x299   : > { %v1130_v18 = vpop.f32.mrf.mxu1  ;;  %2034 = vmatprep.subr.bf16.mxu0 %v2648_v0 }
 0x29a   : > { %v1247_v23 = vsel %vm798_vm3, %v1242_v19, 0  ;;  %v1380_v53 = vpack.c.bf16 %v1130_v18, %v1130_v18 }
 0x29b   : > { %v1132_v20 = vpop.f32.mrf.mxu1 }
 0x29c   : > { %v1444_v21 = vpack.c.bf16 %v1132_v20, %v1132_v20 }
 0x29e   : > { %v1449_v22 = vsel %vm798_vm3, %v1444_v21, 0 }
 0x29f   : > { %2031 = vmatmul.mubr.bf16.vlgmr.msra.gmra.mxu0 %v1135_v14  ;;  %2059 = vmatpush3.bf16.msra.mxu1 %v1449_v22 }
 0x2a0   : > { %2035 = vmatpush3.bf16.msra.mxu0 %v1247_v23  ;;  %2036 = vmatprep.mubr.msk.bf16.mxu0 %vm2649_vm0, %v2648_v0 }
 0x2a1   : > { %2040 = vmatprep.subr.bf16.mxu0 %v2648_v0  ;;  %2070 = vmatprep.subr.bf16.mxu1 %v2648_v0 }
 0x33f   : > { %v1171_v27 = vpop.f32.mrf.mxu0 }
 0x340   : > { %v1219_v28 = vsel %vm1218_vm6, %v1171_v27, -inf }
 0x341   : > { %1220 = vmax.xlane.f32.xlu0 %v1219_v28  ;;  %v2026_v29 = vpop.f32.mrf.mxu0  ;;  %v2264_v28 = vld [vmem:[#allocation18 + $0x28] sm:$0xff]  }
 0x342   : > { %v2265_v29 = vld [vmem:[#allocation18 + $0x20] sm:$0xff]  }
 0x343   : > { %v1174_v30 = vpop.f32.mrf.mxu0 }
 0x344   : > { %v2266_v30 = vld [vmem:[#allocation18 + $0x18] sm:$0xff]  }
 0x345   : > { %v2027_v31 = vpop.f32.mrf.mxu0 }
 0x346   : > { %v2267_v31 = vld [vmem:[#allocation18 + $0x10] sm:$0xff]  }
 0x35f   : > { %v1212_v32 = vpop.f32.mrf.mxu0 }
 0x360   : > { %v1222_v33 = vsel %vm1218_vm6, %v1212_v32, -inf }
 0x361   : > { %1223 = vmax.xlane.f32.xlu0 %v1222_v33  ;;  %v2032_v34 = vpop.f32.mrf.mxu0  ;;  %v2269_v33 = vld [vmem:[#allocation18] sm:$0xff]  }
 0x363   : > { %v1215_v35 = vpop.f32.mrf.mxu0 }
 0x365   : > { %v2033_v36 = vpop.f32.mrf.mxu0 }
 0x3ca   : > { %v1221_v37 = vpop.xlane.xlu0 %1220 }
 0x3ea   : > { %v1224_v38 = vpop.xlane.xlu0 %1223 }
 0x3eb   : > { %v1225_v39 = vmax.f32 %v1221_v37, %v1224_v38 }
 0x3ed   : > { %v1226_v40 = vsub.f32 %v1171_v27, %v1225_v39  ;;  %v1229_v41 = vsub.f32 %v1212_v32, %v1225_v39  ;;  %v2263_v27 = vld [vmem:[#allocation18 + $0x30] sm:$0xff]   ;;  %v2268_v32 = vld [vmem:[#allocation18 + $0x8] sm:$0xff]  }
 0x3ef   : > { %v1227_v42 = vmul.f32 1.442695, %v1226_v40  ;;  %v1230_v43 = vmul.f32 1.442695, %v1229_v41 }
 0x3f1   : > { %2270 = vpow2.f32 %v1227_v42 }
 0x3f2   : > { %2272 = vpow2.f32 %v1230_v43 }
 0x3fe   : > { %v2271_v44 = vpop.eup %2270 }
 0x3ff   : > { %v2273_v46 = vpop.eup %2272  ;;  %v1232_v47 = vsel %vm1218_vm6, %v2271_v44, 0.0  ;;  %v1239_v50 = vpack.c.bf16 %v2271_v44, %v2271_v44 }
 0x400   : > { %1233 = vadd.xlane.f32.xlu0 %v1232_v47  ;;  %v1241_v48 = vpack.c.bf16 %v2273_v46, %v2273_v46  ;;  %v1235_v11 = vsel %vm1218_vm6, %v2273_v46, 0.0 }
 0x402   : > { %2037 = vmatmul.mubr.msk.bf16.vlgmr.msra.gmra.mxu0 %vm1218_vm6, %v1241_v48 }
 0x403   : > { %2041 = vmatpush3.bf16.msra.mxu0 %v1293_v49  ;;  %2042 = vmatprep.mubr.msk.bf16.mxu0 %vm2649_vm0, %v2648_v0 }
 0x404   : > { %2046 = vmatprep.subr.bf16.mxu0 %v2648_v0 }
 0x40a   : > { %2043 = vmatmul.mubr.msk.bf16.vlgmr.msra.gmra.mxu0 %vm1218_vm6, %v1239_v50 }
 0x40b   : > { %2047 = vmatpush3.bf16.xpose.msra.mxu0 %v1339_v51  ;;  %2048 = vmatprep.mubr.msk.bf16.mxu0 %vm2649_vm0, %v2648_v0 }
 0x40c   : > { %2052 = vmatprep.subr.bf16.mxu0 %v2648_v0 }
 0x412   : > { %2049 = vmatmul.mubr.bf16.vlgmr.msra.gmra.mxu0 %v1338_v52 }
 0x413   : > { %2053 = vmatpush3.bf16.xpose.msra.mxu0 %v1380_v53  ;;  %2054 = vmatprep.mubr.msk.bf16.mxu0 %vm2649_vm0, %v2648_v0  ;;  %v1923_v53 = vld [vmem:[%s3293_s22] ss:$0 sm:$0xff] }
 0x414   : > { %2064 = vmatprep.subr.bf16.mxu0 %v2648_v0 }
 0x41a   : > { %2055 = vmatmul.mubr.bf16.vlgmr.msra.gmra.mxu0 %v1338_v52 }
 0x41b   : > { %2065 = vmatpush3.bf16.msra.mxu0 %v1495_v55  ;;  %2066 = vmatprep.mubr.msk.bf16.mxu0 %vm2649_vm0, %v2648_v0 }
 0x489   : > { %v1234_v34 = vpop.xlane.xlu0 %1233 }
 0x4c2   : > { %v1283_v56 = vpop.f32.mrf.mxu0 }
 0x4c4   : > { %v2038_v57 = vpop.f32.mrf.mxu0 }
 0x4c6   : > { %v1286_v58 = vpop.f32.mrf.mxu0 }
 0x4c8   : > { %v2039_v59 = vpop.f32.mrf.mxu0 }
 0x4ca   : > { %v1329_v60 = vpop.f32.mrf.mxu0 }
 0x4cb   : > { %v3138_v61 = vadd.f32 %v1329_v60, %v1283_v56 }
 0x4cc   : > { %v2044_v62 = vpop.f32.mrf.mxu0 }
 0x4ce   : > { %v1332_v63 = vpop.f32.mrf.mxu0 }
 0x4d0   : > { %v2045_v1 = vpop.f32.mrf.mxu0 }
 0x4d2   : > { %v1374_v2 = vpop.f32.mrf.mxu0 }
 0x4d3   : > { %v1421_v3 = vsel %vm1218_vm6, %v1374_v2, -inf }
 0x4d4   : > { %1422 = vmax.xlane.f32.xlu1 %v1421_v3  ;;  %v2050_v4 = vpop.f32.mrf.mxu0 }
 0x4d6   : > { %v1377_v5 = vpop.f32.mrf.mxu0 }
 0x4d8   : > { %v2051_v6 = vpop.f32.mrf.mxu0 }
 0x4da   : > { %v1415_v7 = vpop.f32.mrf.mxu0 }
 0x4db   : > { %v1424_v8 = vsel %vm1218_vm6, %v1415_v7, -inf }
 0x4dc   : > { %1425 = vmax.xlane.f32.xlu1 %v1424_v8  ;;  %v2056_v9 = vpop.f32.mrf.mxu0 }
 0x4de   : > { %v1418_v10 = vpop.f32.mrf.mxu0 }
 0x4e0   : > { %1236 = vadd.xlane.f32.xlu1 %v1235_v11  ;;  %v2057_v12 = vpop.f32.mrf.mxu0 }
 0x55d   : > { %v1423_v13 = vpop.xlane.xlu1 %1422 }
 0x565   : > { %v1426_v14 = vpop.xlane.xlu1 %1425 }
 0x566   : > { %v1427_v15 = vmax.f32 %v1423_v13, %v1426_v14 }
 0x568   : > { %v1428_v16 = vsub.f32 %v1374_v2, %v1427_v15  ;;  %v1431_v17 = vsub.f32 %v1415_v7, %v1427_v15 }
 0x569   : > { %v1237_v35 = vpop.xlane.xlu1 %1236 }
 0x56a   : > { %v1429_v18 = vmul.f32 1.442695, %v1428_v16  ;;  %v1432_v19 = vmul.f32 1.442695, %v1431_v17  ;;  %v1238_v38 = vadd.f32 %v1237_v35, %v1234_v34 }
 0x56c   : > { %2274 = vpow2.f32 %v1429_v18 }
 0x56d   : > { %2276 = vpow2.f32 %v1432_v19 }
 0x56e   : > { %2278 = vrcp.f32 %v1238_v38 }
 0x579   : > { %v2275_v20 = vpop.eup %2274 }
 0x57a   : > { %v2277_v21 = vpop.eup %2276  ;;  %v1434_v22 = vsel %vm1218_vm6, %v2275_v20, 0.0  ;;  %v1441_v23 = vpack.c.bf16 %v2275_v20, %v2275_v20 }
 0x57b   : > { %v1437_v24 = vsel %vm1218_vm6, %v2277_v21, 0.0  ;;  %1435 = vadd.xlane.f32.xlu0 %v1434_v22  ;;  %v1443_v25 = vpack.c.bf16 %v2277_v21, %v2277_v21  ;;  %v2279_v41 = vpop.eup %2278 }
 0x57c   : > { %1438 = vadd.xlane.f32.xlu1 %v1437_v24  ;;  %2067 = vmatmul.mubr.msk.bf16.vlgmr.msra.gmra.mxu0 %vm1218_vm6, %v1441_v23 }
 0x57d   : > { %2061 = vmatmul.mubr.msk.bf16.vlgmr.msra.gmra.mxu1 %vm1218_vm6, %v1443_v25 }
 0x57e   : > { %2086 = vmatprep.mubr.msk.bf16.mxu1 %vm2649_vm0, %v2648_v0  ;;  %2071 = vmatpush3.bf16.msra.mxu1 %v2262_v26 }
 0x57f   : > { %2072 = vmatprep.subr.bf16.mxu1 %v2648_v0 }
 0x582   : > { %2073 = vmatpush3.bf16.msra.mxu1 %v2263_v27 }
 0x583   : > { %2074 = vmatprep.subr.bf16.mxu1 %v2648_v0 }
 0x586   : > { %2075 = vmatpush3.bf16.msra.mxu1 %v2264_v28 }
 0x587   : > { %2076 = vmatprep.subr.bf16.mxu1 %v2648_v0 }
 0x58a   : > { %2077 = vmatpush3.bf16.msra.mxu1 %v2265_v29 }
 0x58b   : > { %2078 = vmatprep.subr.bf16.mxu1 %v2648_v0 }
 0x58e   : > { %2079 = vmatpush3.bf16.msra.mxu1 %v2266_v30 }
 0x58f   : > { %2080 = vmatprep.subr.bf16.mxu1 %v2648_v0 }
 0x592   : > { %2081 = vmatpush3.bf16.msra.mxu1 %v2267_v31 }
 0x593   : > { %2082 = vmatprep.subr.bf16.mxu1 %v2648_v0 }
 0x596   : > { %2083 = vmatpush3.bf16.msra.mxu1 %v2268_v32 }
 0x597   : > { %2084 = vmatprep.subr.bf16.mxu1 %v2648_v0  ;;  %v1336_v0 = vmul.f32 %v2279_v41, %v3138_v61 }
 0x59a   : > { %2085 = vmatpush3.bf16.msra.mxu1 %v2269_v33 }
 0x604   : > { %v1436_v36 = vpop.xlane.xlu0 %1435 }
 0x605   : > { %v1439_v37 = vpop.xlane.xlu1 %1438 }
 0x606   : > { %v1440_v39 = vadd.f32 %v1439_v37, %v1436_v36 }
 0x608   : > { %2280 = vrcp.f32 %v1440_v39 }
 0x615   : > { %v2281_v45 = vpop.eup %2280 }
 0x63c   : > { %v1531_v40 = vpop.f32.mrf.mxu0 }
 0x63d   : > { %v1485_v42 = vpop.f32.mrf.mxu1 }
 0x63e   : > { %v1532_v43 = vadd.f32 %v1531_v40, %v1485_v42  ;;  %v2068_v44 = vpop.f32.mrf.mxu0 }
 0x63f   : > { %v2062_v46 = vpop.f32.mrf.mxu1 }
 0x640   : > { %v1538_v47 = vmul.f32 %v2281_v45, %v1532_v43  ;;  %v1534_v48 = vpop.f32.mrf.mxu0 }
 0x641   : > { %v1488_v49 = vpop.f32.mrf.mxu1 }
 0x642   : > { %v1542_v50 = vpack.c.bf16 %v1538_v47, %v1336_v0  ;;  %v2069_v51 = vpop.f32.mrf.mxu0 }
 0x643   : > { %v2063_v52 = vpop.f32.mrf.mxu1 }
 0x644   : > { %2087 = vmatmul.mubr.bf16.vlgmr.msra.gmra.mxu1 %v1542_v50 }
 0x704   : > { %v1648_v54 = vpop.f32.mrf.mxu1 }
 0x705   : > { %v1649_v55 = vadd.f32 %v1923_v53, %v1648_v54 }
 0x706   : > { %v2088_v56 = vpop.f32.mrf.mxu1 }
 0x707   : > { %1655 = vst [vmem:[%s633_s29] sm:$0xff] %v1649_v55 }
 0x708   : > { %v1651_v57 = vpop.f32.mrf.mxu1 }
 0x709   : > { %v1652_v58 = vadd.f32 %v1923_v53, %v1651_v57 }
 0x70a   : > { %v2089_v59 = vpop.f32.mrf.mxu1 }
 0x70b   : > { %1656 = vst [vmem:[%s633_s29 + $0x8] sm:$0xff] %v1652_v58 }
 0x70c   : > { %2561 = shalt.err (!%p2558_p3)
}
 0x70d   : > { %s2562_s23 = scalar_lea.hbm %s3167_s30, 256  ;;  %s2566_s19 = scalar_lea.hbm %s3295_s15, 512 }
 0x70e   : > { %p2563_p13 = scmp.ne.s32.totalorder %s3167_s30, %s2562_s23  ;;  %p2567_p8 = scmp.lt.s32.totalorder %s3167_s30, %s3295_s15 }
 0x70f   : > { %p2568_p7 = scmp.lt.s32.totalorder %s2566_s19, %s2562_s23 }
 0x710   : > { %p2564_p1 = pnand %p2563_p13, %p3296_p4 }
 0x711   : > { %p2569_p9 = por %p2568_p7, %p2567_p8 }
 0x712   : > { %p2565_p6 = pneg %p2564_p1 }
 0x714   : > { %p2570_p0 = pnand %p2569_p9, %p2565_p6 }
 0x716   : > { %2573 = shalt.err (!%p2570_p0)
}
 0x717   : > { %s2652_s28 = smov 128   ;;  %s2653_s22 = smov 8  }
 0x718   : > { %2124 = dma.vmem_to_hbm [thread:$0]  (%p3296_p4), %s3162_s5, 256, %s3167_s30, %s1658_s1, %s2652_s28, %s2652_s28, %s2653_s22  }
 0x719 PF: > { %s3297_s29 = sld [smem:[#allocation28_spill]] }
 0x71a   : > { %s3298_s12 = sld [smem:[#allocation33_spill]] }
 0x71b   : > { %s3299_s25 = sld [smem:[#allocation29_spill]] }
 0x71f   : > { %s1686_s3 = sand.u32 1, %s3297_s29  }
 0x720   : > { %p3300_p2 = scmp.ne.s32.totalorder %s3298_s12, 0  ;;  %s1687_s16 = scalar_lea.sflag [#allocation5], %s1686_s3 }
 0x721   : > { %p3301_p12 = scmp.ge.s32.totalorder %s3299_s25, 2 }
 0x723   : > { %p2159_p11 = pnand %p3301_p12, %p3300_p2 }
 0x725   : > { %p2160_p10 = pneg %p2159_p11 }
 0x727   : > { %2615 = dma.done.wait (%p2160_p10), %s1687_s16, 256  }
 0x728   : > { %2617 = vsyncadd (%p2160_p10), %s1687_s16, 4294967040  ;;  %s3302_s28 = sld [smem:[#allocation30_spill]]  ;;  %s3304_s25 = smov %s2624_s26 }
 0x729   : > { %s3303_s14 = sld [smem:[#allocation31_spill]]  ;;  %s3305_s26 = smov %s2628_s27 }
 0x72e   : > { %p33_p5 = scmp.ge.s32.totalorder %s3302_s28, 4  }
 0x72f   : > { %s3306_s27 = smov %s3303_s14 }
 0x730   :  { %35 = sbr.rel (!%p33_p5) target bundleno = 19 (0x13), region = 169 }
 0x735   :  { %1692 = vsyncpa [#allocation4], 1 }
 0x736   :  { %1694 = vsyncpa [#allocation4 + $0x1], 1 }
 0x737   :  { %1695 = vsyncpa [#allocation7], 1 }
 0x738   :  { %1697 = vsyncpa [#allocation7 + $0x1], 1 }
 0x739   :  { %1698 = vsyncpa [#allocation10], 1 }
 0x73a   :  { %1699 = vsyncpa [#allocation13], 1 }
 0x73b   :  { %1700 = vsyncpa [#allocation16], 1 }
 0x73c   :  { %1701 = vsyncpa [#allocation19], 1 }
 0x73d   :  { %1702 = vsyncpa [#allocation5], 1 }
 0x73e   :  { %1704 = vsyncpa [#allocation5 + $0x1], 1 }

</bundles_post_ra>
